<compile_context>
chip_gen: v5e
topology: v5e:2x2
jax: 0.10.0
libtpu: 0.0.40
codegen_flags: <defaults>
</compile_context>

<pallas_src>
import functools

import jax
import jax.numpy as jnp
from jax import lax
from jax.experimental import pallas as pl
from jax.experimental.pallas import tpu as pltpu

# ---- model hyperparameters (from the PyTorch script) ----
CLASS_NAMES = ['eyes_closed', 'eyes_closed_head_left', 'eyes_closed_head_right',
               'focused', 'head_down', 'head_up', 'seeing_left', 'seeing_right',
               'yarning']
NUM_CLASSES = len(CLASS_NAMES)        # 9
INPUT_SIZE = NUM_CLASSES              # 9
HIDDEN_SIZE = 64
NUM_LAYERS = 1                        # single layer, as in the module

# ---- padded kernel dimensions ----
B_PAD = 8        # sublane-friendly batch
C_PAD = 128      # lane-friendly output width
H = HIDDEN_SIZE
G = 4 * H        # 256 gate width (2 f32 vregs wide)
T_BLOCK = 128    # timesteps per grid step (large chunk amortizes per-grid-step overhead)
UNROLL = 8       # statically unrolled inner window inside the rolled chunk loop


def lstm_fc_kernel(gx_ref, whh_ref, wfc_ref, bfc_ref, out_ref,
                   h_scr, c_scr, *, t_blk, rem, unroll):
    """One time-chunk of the recurrence; final Linear on the last chunk.

    gx_ref : (t_blk, B_PAD, 4H) f32   precomputed x_t @ W_ih^T + (b_ih + b_hh)
    whh_ref: (H, 4H)            bf16/f32  recurrent weight (pre-transposed)
    wfc_ref: (H, C_PAD)         f32
    bfc_ref: (1, C_PAD)         f32
    out_ref: (B_PAD, C_PAD)     f32
    h_scr, c_scr: (B_PAD, H)    f32 VMEM scratch, persists across grid steps

    `rem` is the (static) number of valid timesteps in the LAST chunk; all other
    chunks run the full t_blk steps with no masking.
    """
    chunk = pl.program_id(0)
    last = pl.num_programs(0) - 1

    @pl.when(chunk == 0)
    def _():
        h_scr[...] = jnp.zeros_like(h_scr)
        c_scr[...] = jnp.zeros_like(c_scr)

    def one_step(t, h, c):
        # Recurrent matmul: (B_PAD, H) x (H, 4H) -> (B_PAD, 4H), f32 accumulation.
        gates = gx_ref[t] + jnp.dot(h.astype(whh_ref.dtype), whh_ref[...],
                                    preferred_element_type=jnp.float32)
        # One wide sigmoid over the vreg-aligned [i | f] slab (lanes 0:128).
        s_if = jax.nn.sigmoid(gates[:, :2 * H])
        i_g = s_if[:, :H]
        f_g = s_if[:, H:2 * H]           # mid-vreg extract (arch floor at H=64: 2 of 4 gates)
        g_g = jnp.tanh(gates[:, 2 * H:3 * H])          # aligned 64-lane slice
        o_g = jax.nn.sigmoid(gates[:, 3 * H:])          # off the c-chain; overlaps tanh(c_new)
        c_new = f_g * c + i_g * g_g
        h_new = o_g * jnp.tanh(c_new)
        return h_new, c_new

    def run_steps(n_steps, h, c):
        # Two-level loop: rolled outer loop over blocks of `unroll` unrolled steps,
        # plus a statically unrolled tail.  n_steps is a static Python int.
        n_outer, tail = divmod(n_steps, unroll)
        if n_outer > 0:
            def outer(oi, carry):
                hh, cc = carry
                base = oi * unroll
                for u in range(unroll):
                    hh, cc = one_step(base + u, hh, cc)
                return hh, cc
            h, c = lax.fori_loop(0, n_outer, outer, (h, c))
        for u in range(tail):
            h, c = one_step(n_outer * unroll + u, h, c)
        return h, c

    def finalize(h):
        out_ref[...] = (jnp.dot(h, wfc_ref[...], preferred_element_type=jnp.float32)
                        + bfc_ref[...])

    if rem == t_blk:
        # T divides evenly into chunks: single hot path, no tail handling anywhere.
        h, c = run_steps(t_blk, h_scr[...], c_scr[...])
        h_scr[...] = h
        c_scr[...] = c

        @pl.when(chunk == last)
        def _():
            finalize(h)
    else:
        # Ragged tail: full chunks run the clean unmasked loop; only the final chunk
        # runs the (static) shorter step count -> padded timesteps never execute.
        @pl.when(chunk < last)
        def _():
            h, c = run_steps(t_blk, h_scr[...], c_scr[...])
            h_scr[...] = h
            c_scr[...] = c

        @pl.when(chunk == last)
        def _():
            h, c = run_steps(rem, h_scr[...], c_scr[...])
            h_scr[...] = h
            c_scr[...] = c
            finalize(h)


def simple_lstm_forward(x, params, t_block=T_BLOCK, unroll=UNROLL,
                        mxu_dtype=jnp.bfloat16):
    """x: (B, T, INPUT_SIZE) float32 (batch_first, like PyTorch). Returns (B, NUM_CLASSES)."""
    B, T, I = x.shape
    assert I == INPUT_SIZE
    assert B <= B_PAD  # TODO(synk): parallel batch grid axis for B > 8 (v7x second core)

    w_ih, w_hh, b_ih, b_hh, w_fc, b_fc = (params[k] for k in
                                          ("w_ih", "w_hh", "b_ih", "b_hh", "w_fc", "b_fc"))

    t_blk = max(1, min(t_block, T))
    n_chunks = pl.cdiv(T, t_blk)
    t_pad = n_chunks * t_blk
    rem = T - (n_chunks - 1) * t_blk          # valid steps in the last chunk (static)

    # ---- glue (pure JAX): hoisted input projection, built directly in padded layout ----
    # Pad the *tiny* x first, then einsum -> gx is written once, already (t_pad, B_PAD, 4H).
    x_pad = jnp.zeros((B_PAD, t_pad, INPUT_SIZE), jnp.float32).at[:B, :T, :].set(
        x.astype(jnp.float32))
    gx = jnp.einsum('bti,gi->tbg', x_pad, w_ih) + (b_ih + b_hh)[None, None, :]

    whh = w_hh.T.astype(mxu_dtype)                                  # (H, 4H) MXU operand
    wfc_pad = jnp.zeros((H, C_PAD), jnp.float32).at[:, :NUM_CLASSES].set(w_fc.T)
    bfc_pad = jnp.zeros((1, C_PAD), jnp.float32).at[0, :NUM_CLASSES].set(b_fc)

    kernel = functools.partial(lstm_fc_kernel, t_blk=t_blk, rem=rem, unroll=unroll)

    out_pad = pl.pallas_call(
        kernel,
        out_shape=jax.ShapeDtypeStruct((B_PAD, C_PAD), jnp.float32),
        grid_spec=pltpu.PrefetchScalarGridSpec(
            num_scalar_prefetch=0,
            grid=(n_chunks,),
            in_specs=[
                pl.BlockSpec((t_blk, B_PAD, G), lambda t: (t, 0, 0)),   # gx streamed over time
                pl.BlockSpec((H, G), lambda t: (0, 0)),                 # W_hh
                pl.BlockSpec((H, C_PAD), lambda t: (0, 0)),             # W_fc
                pl.BlockSpec((1, C_PAD), lambda t: (0, 0)),             # b_fc
            ],
            out_specs=pl.BlockSpec((B_PAD, C_PAD), lambda t: (0, 0)),
            scratch_shapes=[pltpu.VMEM((B_PAD, H), jnp.float32),        # h (persists across chunks)
                            pltpu.VMEM((B_PAD, H), jnp.float32)],       # c
        ),
        compiler_params=pltpu.CompilerParams(
            dimension_semantics=("arbitrary",)),                        # serial recurrence over time
    )(gx, whh, wfc_pad, bfc_pad)

    return out_pad[:B, :NUM_CLASSES]


def init_params(key):
    """Deterministic init matching PyTorch shapes: uniform(-1/sqrt(H), 1/sqrt(H))."""
    k = 1.0 / jnp.sqrt(jnp.float32(HIDDEN_SIZE))
    keys = jax.random.split(key, 6)
    u = lambda kk, shape: jax.random.uniform(kk, shape, jnp.float32, -k, k)
    return {
        "w_ih": u(keys[0], (4 * HIDDEN_SIZE, INPUT_SIZE)),   # lstm.weight_ih_l0
        "w_hh": u(keys[1], (4 * HIDDEN_SIZE, HIDDEN_SIZE)),  # lstm.weight_hh_l0
        "b_ih": u(keys[2], (4 * HIDDEN_SIZE,)),              # lstm.bias_ih_l0
        "b_hh": u(keys[3], (4 * HIDDEN_SIZE,)),              # lstm.bias_hh_l0
        "w_fc": u(keys[4], (NUM_CLASSES, HIDDEN_SIZE)),      # fc.weight
        "b_fc": u(keys[5], (NUM_CLASSES,)),                  # fc.bias
    }


def reference_forward(x, params):
    """Pure-JAX f32 reference of the PyTorch forward (for numerical check)."""
    B, T, _ = x.shape
    w_ih, w_hh = params["w_ih"], params["w_hh"]
    b = params["b_ih"] + params["b_hh"]
    h = jnp.zeros((B, HIDDEN_SIZE), jnp.float32)
    c = jnp.zeros((B, HIDDEN_SIZE), jnp.float32)
    for t in range(T):
        gates = x[:, t, :] @ w_ih.T + h @ w_hh.T + b
        i = jax.nn.sigmoid(gates[:, 0 * H:1 * H])
        f = jax.nn.sigmoid(gates[:, 1 * H:2 * H])
        g = jnp.tanh(gates[:, 2 * H:3 * H])
        o = jax.nn.sigmoid(gates[:, 3 * H:4 * H])
        c = f * c + i * g
        h = o * jnp.tanh(c)
    return h @ params["w_fc"].T + params["b_fc"]


if __name__ == "__main__":
    key = jax.random.PRNGKey(0)
    pkey, xkey, xkey2 = jax.random.split(key, 3)

    params = init_params(pkey)

    # Small case matching the spec's usage (single chunk).
    batch, seq = 2, 8
    x = jax.random.normal(xkey, (batch, seq, INPUT_SIZE), jnp.float32)
    out = jax.block_until_ready(simple_lstm_forward(x, params))
    ref = reference_forward(x, params)
    assert out.shape == (batch, NUM_CLASSES)
    # Tolerance accounts for bf16 recurrent-matmul operands (f32 accumulation / f32 state math).
    assert jnp.allclose(out, ref, atol=5e-3, rtol=5e-3), "mismatch vs reference (T=8)"

    # Multi-chunk + ragged-tail path check: T=37 with t_block=16 -> chunks of 16, 16, 5.
    batch2, seq2 = 3, 37
    x2 = jax.random.normal(xkey2, (batch2, seq2, INPUT_SIZE), jnp.float32)
    out2 = jax.block_until_ready(simple_lstm_forward(x2, params, t_block=16))
    ref2 = reference_forward(x2, params)
    assert out2.shape == (batch2, NUM_CLASSES)
    assert jnp.allclose(out2, ref2, atol=2e-2, rtol=2e-2), "mismatch vs reference (T=37)"

    print("KERNEL_OK")
</pallas_src>

<mosaic_0001>
module attributes {stable_mosaic.version = 11 : i64} {
  func.func @lstm_fc_kernel(%arg0: i32, %arg1: memref<8x8x256xf32, #tpu.memory_space<vmem>>, %arg2: memref<64x256xbf16, #tpu.memory_space<vmem>>, %arg3: memref<64x128xf32, #tpu.memory_space<vmem>>, %arg4: memref<1x128xf32, #tpu.memory_space<vmem>>, %arg5: memref<8x128xf32, #tpu.memory_space<vmem>>, %arg6: memref<8x64xf32, #tpu.memory_space<vmem>>, %arg7: memref<8x64xf32, #tpu.memory_space<vmem>>) attributes {dimension_semantics = [#tpu.dimension_semantics<arbitrary>], iteration_bounds = array<i64: 1>, scalar_prefetch = 0 : i64, scratch_operands = 2 : i64, tpu.core_type = #tpu.core_type<tc>, window_params = [{transform_indices = @transform_0, window_bounds = array<i64: 8, 8, 256>}, {pipeline_mode = #tpu.pipeline_mode<synchronous>, transform_indices = @transform_1, window_bounds = array<i64: 64, 256>}, {pipeline_mode = #tpu.pipeline_mode<synchronous>, transform_indices = @transform_2, window_bounds = array<i64: 64, 128>}, {pipeline_mode = #tpu.pipeline_mode<synchronous>, transform_indices = @transform_3, window_bounds = array<i64: 1, 128>}, {pipeline_mode = #tpu.pipeline_mode<synchronous>, transform_indices = @transform_4, window_bounds = array<i64: 8, 128>}]} {
    %c0_i32 = arith.constant 0 : i32
    %0 = arith.cmpi eq, %arg0, %c0_i32 : i32
    %1 = arith.extui %0 : i1 to i32
    %c0_i32_0 = arith.constant 0 : i32
    %2 = arith.cmpi ne, %1, %c0_i32_0 : i32
    scf.if %2 {
      %cst_68 = arith.constant 0.000000e+00 : f32
      %243 = vector.broadcast %cst_68 : f32 to vector<8x64xf32>
      %c0_69 = arith.constant 0 : index
      %c0_70 = arith.constant 0 : index
      %244 = vector.load %arg6[%c0_69, %c0_70] : memref<8x64xf32, #tpu.memory_space<vmem>>, vector<8x64xf32>
      tpu.vector_store %arg6[%c0_69, %c0_70], %243 {strides = array<i32>} : memref<8x64xf32, #tpu.memory_space<vmem>>, vector<8x64xf32>,
      %cst_71 = arith.constant 0.000000e+00 : f32
      %245 = vector.broadcast %cst_71 : f32 to vector<8x64xf32>
      %c0_72 = arith.constant 0 : index
      %c0_73 = arith.constant 0 : index
      %246 = vector.load %arg7[%c0_72, %c0_73] : memref<8x64xf32, #tpu.memory_space<vmem>>, vector<8x64xf32>
      tpu.vector_store %arg7[%c0_72, %c0_73], %245 {strides = array<i32>} : memref<8x64xf32, #tpu.memory_space<vmem>>, vector<8x64xf32>,
    } else {
    }
    %c0 = arith.constant 0 : index
    %c0_1 = arith.constant 0 : index
    %3 = vector.load %arg6[%c0, %c0_1] : memref<8x64xf32, #tpu.memory_space<vmem>>, vector<8x64xf32>
    %c0_2 = arith.constant 0 : index
    %c0_3 = arith.constant 0 : index
    %4 = vector.load %arg7[%c0_2, %c0_3] : memref<8x64xf32, #tpu.memory_space<vmem>>, vector<8x64xf32>
    %c0_i32_4 = arith.constant 0 : i32
    %c8_i32 = arith.constant 8 : i32
    %5 = arith.muli %c0_i32_4, %c8_i32 : i32
    %c0_i32_5 = arith.constant 0 : i32
    %6 = arith.addi %5, %c0_i32_5 : i32
    %7 = arith.index_cast %6 : i32 to index
    %c0_6 = arith.constant 0 : index
    %c0_7 = arith.constant 0 : index
    %8 = vector.load %arg1[%7, %c0_6, %c0_7] : memref<8x8x256xf32, #tpu.memory_space<vmem>>, vector<1x8x256xf32>
    %9 = vector.shape_cast %8 : vector<1x8x256xf32> to vector<8x256xf32>
    %10 = arith.truncf %3 : vector<8x64xf32> to vector<8x64xbf16>
    %c0_8 = arith.constant 0 : index
    %c0_9 = arith.constant 0 : index
    %11 = vector.load %arg2[%c0_8, %c0_9] : memref<64x256xbf16, #tpu.memory_space<vmem>>, vector<64x256xbf16>
    %cst = arith.constant dense<0.000000e+00> : vector<8x256xf32>
    %12 = tpu.matmul %10, %11, %cst {dimension_numbers = #tpu.dot_dimension_numbers<[1], [0], [0], [1], [0, 0, 1, 1], [], []>} : vector<8x64xbf16>, vector<64x256xbf16>, vector<8x256xf32> -> vector<8x256xf32>
    %13 = arith.addf %9, %12 : vector<8x256xf32>
    %14 = vector.extract_strided_slice %13 {offsets = [0, 0], sizes = [8, 128], strides = [1, 1]} : vector<8x256xf32> to vector<8x128xf32>
    %15 = arith.negf %14 : vector<8x128xf32>
    %16 = math.exp %15 : vector<8x128xf32>
    %cst_10 = arith.constant 1.000000e+00 : f32
    %17 = vector.broadcast %cst_10 : f32 to vector<8x128xf32>
    %18 = arith.addf %17, %16 : vector<8x128xf32>
    %19 = arith.divf %17, %18 : vector<8x128xf32>
    %20 = vector.extract_strided_slice %19 {offsets = [0, 0], sizes = [8, 64], strides = [1, 1]} : vector<8x128xf32> to vector<8x64xf32>
    %21 = vector.extract_strided_slice %19 {offsets = [0, 64], sizes = [8, 64], strides = [1, 1]} : vector<8x128xf32> to vector<8x64xf32>
    %22 = vector.extract_strided_slice %13 {offsets = [0, 128], sizes = [8, 64], strides = [1, 1]} : vector<8x256xf32> to vector<8x64xf32>
    %23 = math.tanh %22 : vector<8x64xf32>
    %24 = vector.extract_strided_slice %13 {offsets = [0, 192], sizes = [8, 64], strides = [1, 1]} : vector<8x256xf32> to vector<8x64xf32>
    %25 = arith.negf %24 : vector<8x64xf32>
    %26 = math.exp %25 : vector<8x64xf32>
    %cst_11 = arith.constant 1.000000e+00 : f32
    %27 = vector.broadcast %cst_11 : f32 to vector<8x64xf32>
    %28 = arith.addf %27, %26 : vector<8x64xf32>
    %29 = arith.divf %27, %28 : vector<8x64xf32>
    %30 = arith.mulf %21, %4 : vector<8x64xf32>
    %31 = arith.mulf %20, %23 : vector<8x64xf32>
    %32 = arith.addf %30, %31 : vector<8x64xf32>
    %33 = math.tanh %32 : vector<8x64xf32>
    %34 = arith.mulf %29, %33 : vector<8x64xf32>
    %c1_i32 = arith.constant 1 : i32
    %35 = arith.addi %5, %c1_i32 : i32
    %36 = arith.index_cast %35 : i32 to index
    %c0_12 = arith.constant 0 : index
    %c0_13 = arith.constant 0 : index
    %37 = vector.load %arg1[%36, %c0_12, %c0_13] : memref<8x8x256xf32, #tpu.memory_space<vmem>>, vector<1x8x256xf32>
    %38 = vector.shape_cast %37 : vector<1x8x256xf32> to vector<8x256xf32>
    %39 = arith.truncf %34 : vector<8x64xf32> to vector<8x64xbf16>
    %c0_14 = arith.constant 0 : index
    %c0_15 = arith.constant 0 : index
    %40 = vector.load %arg2[%c0_14, %c0_15] : memref<64x256xbf16, #tpu.memory_space<vmem>>, vector<64x256xbf16>
    %cst_16 = arith.constant dense<0.000000e+00> : vector<8x256xf32>
    %41 = tpu.matmul %39, %40, %cst_16 {dimension_numbers = #tpu.dot_dimension_numbers<[1], [0], [0], [1], [0, 0, 1, 1], [], []>} : vector<8x64xbf16>, vector<64x256xbf16>, vector<8x256xf32> -> vector<8x256xf32>
    %42 = arith.addf %38, %41 : vector<8x256xf32>
    %43 = vector.extract_strided_slice %42 {offsets = [0, 0], sizes = [8, 128], strides = [1, 1]} : vector<8x256xf32> to vector<8x128xf32>
    %44 = arith.negf %43 : vector<8x128xf32>
    %45 = math.exp %44 : vector<8x128xf32>
    %cst_17 = arith.constant 1.000000e+00 : f32
    %46 = vector.broadcast %cst_17 : f32 to vector<8x128xf32>
    %47 = arith.addf %46, %45 : vector<8x128xf32>
    %48 = arith.divf %46, %47 : vector<8x128xf32>
    %49 = vector.extract_strided_slice %48 {offsets = [0, 0], sizes = [8, 64], strides = [1, 1]} : vector<8x128xf32> to vector<8x64xf32>
    %50 = vector.extract_strided_slice %48 {offsets = [0, 64], sizes = [8, 64], strides = [1, 1]} : vector<8x128xf32> to vector<8x64xf32>
    %51 = vector.extract_strided_slice %42 {offsets = [0, 128], sizes = [8, 64], strides = [1, 1]} : vector<8x256xf32> to vector<8x64xf32>
    %52 = math.tanh %51 : vector<8x64xf32>
    %53 = vector.extract_strided_slice %42 {offsets = [0, 192], sizes = [8, 64], strides = [1, 1]} : vector<8x256xf32> to vector<8x64xf32>
    %54 = arith.negf %53 : vector<8x64xf32>
    %55 = math.exp %54 : vector<8x64xf32>
    %cst_18 = arith.constant 1.000000e+00 : f32
    %56 = vector.broadcast %cst_18 : f32 to vector<8x64xf32>
    %57 = arith.addf %56, %55 : vector<8x64xf32>
    %58 = arith.divf %56, %57 : vector<8x64xf32>
    %59 = arith.mulf %50, %32 : vector<8x64xf32>
    %60 = arith.mulf %49, %52 : vector<8x64xf32>
    %61 = arith.addf %59, %60 : vector<8x64xf32>
    %62 = math.tanh %61 : vector<8x64xf32>
    %63 = arith.mulf %58, %62 : vector<8x64xf32>
    %c2_i32 = arith.constant 2 : i32
    %64 = arith.addi %5, %c2_i32 : i32
    %65 = arith.index_cast %64 : i32 to index
    %c0_19 = arith.constant 0 : index
    %c0_20 = arith.constant 0 : index
    %66 = vector.load %arg1[%65, %c0_19, %c0_20] : memref<8x8x256xf32, #tpu.memory_space<vmem>>, vector<1x8x256xf32>
    %67 = vector.shape_cast %66 : vector<1x8x256xf32> to vector<8x256xf32>
    %68 = arith.truncf %63 : vector<8x64xf32> to vector<8x64xbf16>
    %c0_21 = arith.constant 0 : index
    %c0_22 = arith.constant 0 : index
    %69 = vector.load %arg2[%c0_21, %c0_22] : memref<64x256xbf16, #tpu.memory_space<vmem>>, vector<64x256xbf16>
    %cst_23 = arith.constant dense<0.000000e+00> : vector<8x256xf32>
    %70 = tpu.matmul %68, %69, %cst_23 {dimension_numbers = #tpu.dot_dimension_numbers<[1], [0], [0], [1], [0, 0, 1, 1], [], []>} : vector<8x64xbf16>, vector<64x256xbf16>, vector<8x256xf32> -> vector<8x256xf32>
    %71 = arith.addf %67, %70 : vector<8x256xf32>
    %72 = vector.extract_strided_slice %71 {offsets = [0, 0], sizes = [8, 128], strides = [1, 1]} : vector<8x256xf32> to vector<8x128xf32>
    %73 = arith.negf %72 : vector<8x128xf32>
    %74 = math.exp %73 : vector<8x128xf32>
    %cst_24 = arith.constant 1.000000e+00 : f32
    %75 = vector.broadcast %cst_24 : f32 to vector<8x128xf32>
    %76 = arith.addf %75, %74 : vector<8x128xf32>
    %77 = arith.divf %75, %76 : vector<8x128xf32>
    %78 = vector.extract_strided_slice %77 {offsets = [0, 0], sizes = [8, 64], strides = [1, 1]} : vector<8x128xf32> to vector<8x64xf32>
    %79 = vector.extract_strided_slice %77 {offsets = [0, 64], sizes = [8, 64], strides = [1, 1]} : vector<8x128xf32> to vector<8x64xf32>
    %80 = vector.extract_strided_slice %71 {offsets = [0, 128], sizes = [8, 64], strides = [1, 1]} : vector<8x256xf32> to vector<8x64xf32>
    %81 = math.tanh %80 : vector<8x64xf32>
    %82 = vector.extract_strided_slice %71 {offsets = [0, 192], sizes = [8, 64], strides = [1, 1]} : vector<8x256xf32> to vector<8x64xf32>
    %83 = arith.negf %82 : vector<8x64xf32>
    %84 = math.exp %83 : vector<8x64xf32>
    %cst_25 = arith.constant 1.000000e+00 : f32
    %85 = vector.broadcast %cst_25 : f32 to vector<8x64xf32>
    %86 = arith.addf %85, %84 : vector<8x64xf32>
    %87 = arith.divf %85, %86 : vector<8x64xf32>
    %88 = arith.mulf %79, %61 : vector<8x64xf32>
    %89 = arith.mulf %78, %81 : vector<8x64xf32>
    %90 = arith.addf %88, %89 : vector<8x64xf32>
    %91 = math.tanh %90 : vector<8x64xf32>
    %92 = arith.mulf %87, %91 : vector<8x64xf32>
    %c3_i32 = arith.constant 3 : i32
    %93 = arith.addi %5, %c3_i32 : i32
    %94 = arith.index_cast %93 : i32 to index
    %c0_26 = arith.constant 0 : index
    %c0_27 = arith.constant 0 : index
    %95 = vector.load %arg1[%94, %c0_26, %c0_27] : memref<8x8x256xf32, #tpu.memory_space<vmem>>, vector<1x8x256xf32>
    %96 = vector.shape_cast %95 : vector<1x8x256xf32> to vector<8x256xf32>
    %97 = arith.truncf %92 : vector<8x64xf32> to vector<8x64xbf16>
    %c0_28 = arith.constant 0 : index
    %c0_29 = arith.constant 0 : index
    %98 = vector.load %arg2[%c0_28, %c0_29] : memref<64x256xbf16, #tpu.memory_space<vmem>>, vector<64x256xbf16>
    %cst_30 = arith.constant dense<0.000000e+00> : vector<8x256xf32>
    %99 = tpu.matmul %97, %98, %cst_30 {dimension_numbers = #tpu.dot_dimension_numbers<[1], [0], [0], [1], [0, 0, 1, 1], [], []>} : vector<8x64xbf16>, vector<64x256xbf16>, vector<8x256xf32> -> vector<8x256xf32>
    %100 = arith.addf %96, %99 : vector<8x256xf32>
    %101 = vector.extract_strided_slice %100 {offsets = [0, 0], sizes = [8, 128], strides = [1, 1]} : vector<8x256xf32> to vector<8x128xf32>
    %102 = arith.negf %101 : vector<8x128xf32>
    %103 = math.exp %102 : vector<8x128xf32>
    %cst_31 = arith.constant 1.000000e+00 : f32
    %104 = vector.broadcast %cst_31 : f32 to vector<8x128xf32>
    %105 = arith.addf %104, %103 : vector<8x128xf32>
    %106 = arith.divf %104, %105 : vector<8x128xf32>
    %107 = vector.extract_strided_slice %106 {offsets = [0, 0], sizes = [8, 64], strides = [1, 1]} : vector<8x128xf32> to vector<8x64xf32>
    %108 = vector.extract_strided_slice %106 {offsets = [0, 64], sizes = [8, 64], strides = [1, 1]} : vector<8x128xf32> to vector<8x64xf32>
    %109 = vector.extract_strided_slice %100 {offsets = [0, 128], sizes = [8, 64], strides = [1, 1]} : vector<8x256xf32> to vector<8x64xf32>
    %110 = math.tanh %109 : vector<8x64xf32>
    %111 = vector.extract_strided_slice %100 {offsets = [0, 192], sizes = [8, 64], strides = [1, 1]} : vector<8x256xf32> to vector<8x64xf32>
    %112 = arith.negf %111 : vector<8x64xf32>
    %113 = math.exp %112 : vector<8x64xf32>
    %cst_32 = arith.constant 1.000000e+00 : f32
    %114 = vector.broadcast %cst_32 : f32 to vector<8x64xf32>
    %115 = arith.addf %114, %113 : vector<8x64xf32>
    %116 = arith.divf %114, %115 : vector<8x64xf32>
    %117 = arith.mulf %108, %90 : vector<8x64xf32>
    %118 = arith.mulf %107, %110 : vector<8x64xf32>
    %119 = arith.addf %117, %118 : vector<8x64xf32>
    %120 = math.tanh %119 : vector<8x64xf32>
    %121 = arith.mulf %116, %120 : vector<8x64xf32>
    %c4_i32 = arith.constant 4 : i32
    %122 = arith.addi %5, %c4_i32 : i32
    %123 = arith.index_cast %122 : i32 to index
    %c0_33 = arith.constant 0 : index
    %c0_34 = arith.constant 0 : index
    %124 = vector.load %arg1[%123, %c0_33, %c0_34] : memref<8x8x256xf32, #tpu.memory_space<vmem>>, vector<1x8x256xf32>
    %125 = vector.shape_cast %124 : vector<1x8x256xf32> to vector<8x256xf32>
    %126 = arith.truncf %121 : vector<8x64xf32> to vector<8x64xbf16>
    %c0_35 = arith.constant 0 : index
    %c0_36 = arith.constant 0 : index
    %127 = vector.load %arg2[%c0_35, %c0_36] : memref<64x256xbf16, #tpu.memory_space<vmem>>, vector<64x256xbf16>
    %cst_37 = arith.constant dense<0.000000e+00> : vector<8x256xf32>
    %128 = tpu.matmul %126, %127, %cst_37 {dimension_numbers = #tpu.dot_dimension_numbers<[1], [0], [0], [1], [0, 0, 1, 1], [], []>} : vector<8x64xbf16>, vector<64x256xbf16>, vector<8x256xf32> -> vector<8x256xf32>
    %129 = arith.addf %125, %128 : vector<8x256xf32>
    %130 = vector.extract_strided_slice %129 {offsets = [0, 0], sizes = [8, 128], strides = [1, 1]} : vector<8x256xf32> to vector<8x128xf32>
    %131 = arith.negf %130 : vector<8x128xf32>
    %132 = math.exp %131 : vector<8x128xf32>
    %cst_38 = arith.constant 1.000000e+00 : f32
    %133 = vector.broadcast %cst_38 : f32 to vector<8x128xf32>
    %134 = arith.addf %133, %132 : vector<8x128xf32>
    %135 = arith.divf %133, %134 : vector<8x128xf32>
    %136 = vector.extract_strided_slice %135 {offsets = [0, 0], sizes = [8, 64], strides = [1, 1]} : vector<8x128xf32> to vector<8x64xf32>
    %137 = vector.extract_strided_slice %135 {offsets = [0, 64], sizes = [8, 64], strides = [1, 1]} : vector<8x128xf32> to vector<8x64xf32>
    %138 = vector.extract_strided_slice %129 {offsets = [0, 128], sizes = [8, 64], strides = [1, 1]} : vector<8x256xf32> to vector<8x64xf32>
    %139 = math.tanh %138 : vector<8x64xf32>
    %140 = vector.extract_strided_slice %129 {offsets = [0, 192], sizes = [8, 64], strides = [1, 1]} : vector<8x256xf32> to vector<8x64xf32>
    %141 = arith.negf %140 : vector<8x64xf32>
    %142 = math.exp %141 : vector<8x64xf32>
    %cst_39 = arith.constant 1.000000e+00 : f32
    %143 = vector.broadcast %cst_39 : f32 to vector<8x64xf32>
    %144 = arith.addf %143, %142 : vector<8x64xf32>
    %145 = arith.divf %143, %144 : vector<8x64xf32>
    %146 = arith.mulf %137, %119 : vector<8x64xf32>
    %147 = arith.mulf %136, %139 : vector<8x64xf32>
    %148 = arith.addf %146, %147 : vector<8x64xf32>
    %149 = math.tanh %148 : vector<8x64xf32>
    %150 = arith.mulf %145, %149 : vector<8x64xf32>
    %c5_i32 = arith.constant 5 : i32
    %151 = arith.addi %5, %c5_i32 : i32
    %152 = arith.index_cast %151 : i32 to index
    %c0_40 = arith.constant 0 : index
    %c0_41 = arith.constant 0 : index
    %153 = vector.load %arg1[%152, %c0_40, %c0_41] : memref<8x8x256xf32, #tpu.memory_space<vmem>>, vector<1x8x256xf32>
    %154 = vector.shape_cast %153 : vector<1x8x256xf32> to vector<8x256xf32>
    %155 = arith.truncf %150 : vector<8x64xf32> to vector<8x64xbf16>
    %c0_42 = arith.constant 0 : index
    %c0_43 = arith.constant 0 : index
    %156 = vector.load %arg2[%c0_42, %c0_43] : memref<64x256xbf16, #tpu.memory_space<vmem>>, vector<64x256xbf16>
    %cst_44 = arith.constant dense<0.000000e+00> : vector<8x256xf32>
    %157 = tpu.matmul %155, %156, %cst_44 {dimension_numbers = #tpu.dot_dimension_numbers<[1], [0], [0], [1], [0, 0, 1, 1], [], []>} : vector<8x64xbf16>, vector<64x256xbf16>, vector<8x256xf32> -> vector<8x256xf32>
    %158 = arith.addf %154, %157 : vector<8x256xf32>
    %159 = vector.extract_strided_slice %158 {offsets = [0, 0], sizes = [8, 128], strides = [1, 1]} : vector<8x256xf32> to vector<8x128xf32>
    %160 = arith.negf %159 : vector<8x128xf32>
    %161 = math.exp %160 : vector<8x128xf32>
    %cst_45 = arith.constant 1.000000e+00 : f32
    %162 = vector.broadcast %cst_45 : f32 to vector<8x128xf32>
    %163 = arith.addf %162, %161 : vector<8x128xf32>
    %164 = arith.divf %162, %163 : vector<8x128xf32>
    %165 = vector.extract_strided_slice %164 {offsets = [0, 0], sizes = [8, 64], strides = [1, 1]} : vector<8x128xf32> to vector<8x64xf32>
    %166 = vector.extract_strided_slice %164 {offsets = [0, 64], sizes = [8, 64], strides = [1, 1]} : vector<8x128xf32> to vector<8x64xf32>
    %167 = vector.extract_strided_slice %158 {offsets = [0, 128], sizes = [8, 64], strides = [1, 1]} : vector<8x256xf32> to vector<8x64xf32>
    %168 = math.tanh %167 : vector<8x64xf32>
    %169 = vector.extract_strided_slice %158 {offsets = [0, 192], sizes = [8, 64], strides = [1, 1]} : vector<8x256xf32> to vector<8x64xf32>
    %170 = arith.negf %169 : vector<8x64xf32>
    %171 = math.exp %170 : vector<8x64xf32>
    %cst_46 = arith.constant 1.000000e+00 : f32
    %172 = vector.broadcast %cst_46 : f32 to vector<8x64xf32>
    %173 = arith.addf %172, %171 : vector<8x64xf32>
    %174 = arith.divf %172, %173 : vector<8x64xf32>
    %175 = arith.mulf %166, %148 : vector<8x64xf32>
    %176 = arith.mulf %165, %168 : vector<8x64xf32>
    %177 = arith.addf %175, %176 : vector<8x64xf32>
    %178 = math.tanh %177 : vector<8x64xf32>
    %179 = arith.mulf %174, %178 : vector<8x64xf32>
    %c6_i32 = arith.constant 6 : i32
    %180 = arith.addi %5, %c6_i32 : i32
    %181 = arith.index_cast %180 : i32 to index
    %c0_47 = arith.constant 0 : index
    %c0_48 = arith.constant 0 : index
    %182 = vector.load %arg1[%181, %c0_47, %c0_48] : memref<8x8x256xf32, #tpu.memory_space<vmem>>, vector<1x8x256xf32>
    %183 = vector.shape_cast %182 : vector<1x8x256xf32> to vector<8x256xf32>
    %184 = arith.truncf %179 : vector<8x64xf32> to vector<8x64xbf16>
    %c0_49 = arith.constant 0 : index
    %c0_50 = arith.constant 0 : index
    %185 = vector.load %arg2[%c0_49, %c0_50] : memref<64x256xbf16, #tpu.memory_space<vmem>>, vector<64x256xbf16>
    %cst_51 = arith.constant dense<0.000000e+00> : vector<8x256xf32>
    %186 = tpu.matmul %184, %185, %cst_51 {dimension_numbers = #tpu.dot_dimension_numbers<[1], [0], [0], [1], [0, 0, 1, 1], [], []>} : vector<8x64xbf16>, vector<64x256xbf16>, vector<8x256xf32> -> vector<8x256xf32>
    %187 = arith.addf %183, %186 : vector<8x256xf32>
    %188 = vector.extract_strided_slice %187 {offsets = [0, 0], sizes = [8, 128], strides = [1, 1]} : vector<8x256xf32> to vector<8x128xf32>
    %189 = arith.negf %188 : vector<8x128xf32>
    %190 = math.exp %189 : vector<8x128xf32>
    %cst_52 = arith.constant 1.000000e+00 : f32
    %191 = vector.broadcast %cst_52 : f32 to vector<8x128xf32>
    %192 = arith.addf %191, %190 : vector<8x128xf32>
    %193 = arith.divf %191, %192 : vector<8x128xf32>
    %194 = vector.extract_strided_slice %193 {offsets = [0, 0], sizes = [8, 64], strides = [1, 1]} : vector<8x128xf32> to vector<8x64xf32>
    %195 = vector.extract_strided_slice %193 {offsets = [0, 64], sizes = [8, 64], strides = [1, 1]} : vector<8x128xf32> to vector<8x64xf32>
    %196 = vector.extract_strided_slice %187 {offsets = [0, 128], sizes = [8, 64], strides = [1, 1]} : vector<8x256xf32> to vector<8x64xf32>
    %197 = math.tanh %196 : vector<8x64xf32>
    %198 = vector.extract_strided_slice %187 {offsets = [0, 192], sizes = [8, 64], strides = [1, 1]} : vector<8x256xf32> to vector<8x64xf32>
    %199 = arith.negf %198 : vector<8x64xf32>
    %200 = math.exp %199 : vector<8x64xf32>
    %cst_53 = arith.constant 1.000000e+00 : f32
    %201 = vector.broadcast %cst_53 : f32 to vector<8x64xf32>
    %202 = arith.addf %201, %200 : vector<8x64xf32>
    %203 = arith.divf %201, %202 : vector<8x64xf32>
    %204 = arith.mulf %195, %177 : vector<8x64xf32>
    %205 = arith.mulf %194, %197 : vector<8x64xf32>
    %206 = arith.addf %204, %205 : vector<8x64xf32>
    %207 = math.tanh %206 : vector<8x64xf32>
    %208 = arith.mulf %203, %207 : vector<8x64xf32>
    %c7_i32 = arith.constant 7 : i32
    %209 = arith.addi %5, %c7_i32 : i32
    %210 = arith.index_cast %209 : i32 to index
    %c0_54 = arith.constant 0 : index
    %c0_55 = arith.constant 0 : index
    %211 = vector.load %arg1[%210, %c0_54, %c0_55] : memref<8x8x256xf32, #tpu.memory_space<vmem>>, vector<1x8x256xf32>
    %212 = vector.shape_cast %211 : vector<1x8x256xf32> to vector<8x256xf32>
    %213 = arith.truncf %208 : vector<8x64xf32> to vector<8x64xbf16>
    %c0_56 = arith.constant 0 : index
    %c0_57 = arith.constant 0 : index
    %214 = vector.load %arg2[%c0_56, %c0_57] : memref<64x256xbf16, #tpu.memory_space<vmem>>, vector<64x256xbf16>
    %cst_58 = arith.constant dense<0.000000e+00> : vector<8x256xf32>
    %215 = tpu.matmul %213, %214, %cst_58 {dimension_numbers = #tpu.dot_dimension_numbers<[1], [0], [0], [1], [0, 0, 1, 1], [], []>} : vector<8x64xbf16>, vector<64x256xbf16>, vector<8x256xf32> -> vector<8x256xf32>
    %216 = arith.addf %212, %215 : vector<8x256xf32>
    %217 = vector.extract_strided_slice %216 {offsets = [0, 0], sizes = [8, 128], strides = [1, 1]} : vector<8x256xf32> to vector<8x128xf32>
    %218 = arith.negf %217 : vector<8x128xf32>
    %219 = math.exp %218 : vector<8x128xf32>
    %cst_59 = arith.constant 1.000000e+00 : f32
    %220 = vector.broadcast %cst_59 : f32 to vector<8x128xf32>
    %221 = arith.addf %220, %219 : vector<8x128xf32>
    %222 = arith.divf %220, %221 : vector<8x128xf32>
    %223 = vector.extract_strided_slice %222 {offsets = [0, 0], sizes = [8, 64], strides = [1, 1]} : vector<8x128xf32> to vector<8x64xf32>
    %224 = vector.extract_strided_slice %222 {offsets = [0, 64], sizes = [8, 64], strides = [1, 1]} : vector<8x128xf32> to vector<8x64xf32>
    %225 = vector.extract_strided_slice %216 {offsets = [0, 128], sizes = [8, 64], strides = [1, 1]} : vector<8x256xf32> to vector<8x64xf32>
    %226 = math.tanh %225 : vector<8x64xf32>
    %227 = vector.extract_strided_slice %216 {offsets = [0, 192], sizes = [8, 64], strides = [1, 1]} : vector<8x256xf32> to vector<8x64xf32>
    %228 = arith.negf %227 : vector<8x64xf32>
    %229 = math.exp %228 : vector<8x64xf32>
    %cst_60 = arith.constant 1.000000e+00 : f32
    %230 = vector.broadcast %cst_60 : f32 to vector<8x64xf32>
    %231 = arith.addf %230, %229 : vector<8x64xf32>
    %232 = arith.divf %230, %231 : vector<8x64xf32>
    %233 = arith.mulf %224, %206 : vector<8x64xf32>
    %234 = arith.mulf %223, %226 : vector<8x64xf32>
    %235 = arith.addf %233, %234 : vector<8x64xf32>
    %236 = math.tanh %235 : vector<8x64xf32>
    %237 = arith.mulf %232, %236 : vector<8x64xf32>
    %c1_i32_61 = arith.constant 1 : i32
    %c0_62 = arith.constant 0 : index
    %c0_63 = arith.constant 0 : index
    %238 = vector.load %arg6[%c0_62, %c0_63] : memref<8x64xf32, #tpu.memory_space<vmem>>, vector<8x64xf32>
    tpu.vector_store %arg6[%c0_62, %c0_63], %237 {strides = array<i32>} : memref<8x64xf32, #tpu.memory_space<vmem>>, vector<8x64xf32>,
    %c0_64 = arith.constant 0 : index
    %c0_65 = arith.constant 0 : index
    %239 = vector.load %arg7[%c0_64, %c0_65] : memref<8x64xf32, #tpu.memory_space<vmem>>, vector<8x64xf32>
    tpu.vector_store %arg7[%c0_64, %c0_65], %235 {strides = array<i32>} : memref<8x64xf32, #tpu.memory_space<vmem>>, vector<8x64xf32>,
    %c0_i32_66 = arith.constant 0 : i32
    %240 = arith.cmpi eq, %arg0, %c0_i32_66 : i32
    %241 = arith.extui %240 : i1 to i32
    %c0_i32_67 = arith.constant 0 : i32
    %242 = arith.cmpi ne, %241, %c0_i32_67 : i32
    scf.if %242 {
      %c0_68 = arith.constant 0 : index
      %c0_69 = arith.constant 0 : index
      %243 = vector.load %arg3[%c0_68, %c0_69] : memref<64x128xf32, #tpu.memory_space<vmem>>, vector<64x128xf32>
      %cst_70 = arith.constant dense<0.000000e+00> : vector<8x128xf32>
      %244 = tpu.matmul %237, %243, %cst_70 {dimension_numbers = #tpu.dot_dimension_numbers<[1], [0], [0], [1], [0, 0, 1, 1], [], []>} : vector<8x64xf32>, vector<64x128xf32>, vector<8x128xf32> -> vector<8x128xf32>
      %c0_71 = arith.constant 0 : index
      %c0_72 = arith.constant 0 : index
      %245 = vector.load %arg4[%c0_71, %c0_72] : memref<1x128xf32, #tpu.memory_space<vmem>>, vector<1x128xf32>
      %246 = vector.broadcast %245 : vector<1x128xf32> to vector<8x128xf32>
      %247 = arith.addf %244, %246 : vector<8x128xf32>
      %c0_73 = arith.constant 0 : index
      %c0_74 = arith.constant 0 : index
      %248 = vector.load %arg5[%c0_73, %c0_74] : memref<8x128xf32, #tpu.memory_space<vmem>>, vector<8x128xf32>
      tpu.vector_store %arg5[%c0_73, %c0_74], %247 {strides = array<i32>} : memref<8x128xf32, #tpu.memory_space<vmem>>, vector<8x128xf32>,
    } else {
    }
    return
  }
  func.func @transform_0(%arg0: i32) -> (i32, i32, i32) {
    %c0_i32 = arith.constant 0 : i32
    %c0_i32_0 = arith.constant 0 : i32
    %c0_i32_1 = arith.constant 0 : i32
    return %arg0, %c0_i32, %c0_i32_0 : i32, i32, i32
  }
  func.func @transform_1(%arg0: i32) -> (i32, i32) {
    %c0_i32 = arith.constant 0 : i32
    %c0_i32_0 = arith.constant 0 : i32
    %c0_i32_1 = arith.constant 0 : i32
    return %c0_i32, %c0_i32_0 : i32, i32
  }
  func.func @transform_2(%arg0: i32) -> (i32, i32) {
    %c0_i32 = arith.constant 0 : i32
    %c0_i32_0 = arith.constant 0 : i32
    %c0_i32_1 = arith.constant 0 : i32
    return %c0_i32, %c0_i32_0 : i32, i32
  }
  func.func @transform_3(%arg0: i32) -> (i32, i32) {
    %c0_i32 = arith.constant 0 : i32
    %c0_i32_0 = arith.constant 0 : i32
    %c0_i32_1 = arith.constant 0 : i32
    return %c0_i32, %c0_i32_0 : i32, i32
  }
  func.func @transform_4(%arg0: i32) -> (i32, i32) {
    %c0_i32 = arith.constant 0 : i32
    %c0_i32_0 = arith.constant 0 : i32
    %c0_i32_1 = arith.constant 0 : i32
    return %c0_i32, %c0_i32_0 : i32, i32
  }
}

</mosaic_0001>

<bundles_post_ra>
// kernel: tpu_custom_call.1
= control target key start
LH: loop header
LB: loop body
LE: loop exit
PB: predicated region body
PF: predicated region fallthrough
CT: control target
= control target key end

     0   :  { %9 = vsyncpa [#allocation5], 0  ;;  %s1341_s0 = inlined_call_operand.hbm [shape: f32[8,8,256], index: 0, kind: input, shape index: {}]   ;;  %s1342_s1 = inlined_call_operand.hbm [shape: bf16[64,256], index: 1, kind: input, shape index: {}]   ;;  %s1343_s2 = inlined_call_operand.hbm [shape: f32[64,128], index: 2, kind: input, shape index: {}]   ;;  %s1344_s3 = inlined_call_operand.vmem [shape: f32[1,128], index: 3, kind: input, shape index: {}]   ;;  %s1345_s4 = inlined_call_operand.hbm [shape: f32[8,128], index: 4, kind: output, shape index: {}]  }
   0x1   :  { %10 = vsyncpa [#allocation8], 0  ;;  %s29_s17 = sshll.u32 %s1342_s1, 4  ;;  %s30_s17 = int_to_ptr.hbm [resolvable:$true] %s29_s17 }
   0x2   :  { %11 = vsyncpa [#allocation6], 0  ;;  %s1160_s18 = smov [#allocation7]   ;;  %s16_s22 = sshll.u32 %s1341_s0, 4  ;;  %s17_s22 = int_to_ptr.hbm [resolvable:$true] %s16_s22 }
   0x3   :  { %s31_s19 = sshll.u32 %s1160_s18, 4  ;;  %s1161_s23 = smov 128   ;;  %s32_s19 = int_to_ptr.vmem [resolvable:$true] %s31_s19 }
   0x4   :  { %s1162_s24 = smov 8   ;;  %s1163_s25 = smov [#allocation4]  }
   0x5   :  { %37 = dma.hbm_to_vmem [thread:$0]  %s30_s17, 1024, %s32_s19, [#allocation8], %s1161_s23, %s1161_s23, %s1162_s24  }
   0x6   :  { %s18_s26 = sshll.u32 %s1163_s25, 4  ;;  %s1164_s27 = smov 256   ;;  %s19_s26 = int_to_ptr.vmem [resolvable:$true] %s18_s26 }
   0x7   :  { %s1165_s28 = smov 16   ;;  %s42_s30 = sshll.u32 %s1343_s2, 4  ;;  %s43_s30 = int_to_ptr.hbm [resolvable:$true] %s42_s30 }
   0x8   :  { %24 = dma.hbm_to_vmem [thread:$0]  %s17_s22, 2048, %s19_s26, [#allocation5], %s1164_s27, %s1164_s27, %s1165_s28  }
   0x9   :  { %s1166_s5 = smov [#allocation9]  }
   0xa   :  { %s44_s6 = sshll.u32 %s1166_s5, 4  ;;  %s45_s6 = int_to_ptr.vmem [resolvable:$true] %s44_s6 }
   0xb   :  { %50 = dma.hbm_to_vmem [thread:$0]  %s43_s30, 1024, %s45_s6, [#allocation8], %s1161_s23, %s1161_s23, %s1162_s24  }
   0xc   :  { %1154 = dma.done.wait [#allocation5], 2048  }
   0xd   :  { %1155 = vsyncadd [#allocation5], 4294965248 }
   0xe   :  { %1156 = dma.done.wait [#allocation8], 2048  }
   0xf   :  { %1157 = vsyncadd [#allocation8], 4294965248  ;;  %vm70_vm0 = vcmask 523264   ;;  %v1167_v0 = vmov 0.0   ;;  %v904_v1 = vld [vmem:[#allocation7 + $0x30] sm:$0xf] }
  0x10   :  { %71 = vst.msk [vmem:[#allocation2] sm:$0xff] %vm70_vm0, %v1167_v0  ;;  %v950_v2 = vld [vmem:[#allocation7 + $0x34] sm:$0xf0]  ;;  %v896_v3 = vld [vmem:[#allocation7 + $0x20] sm:$0xf]  ;;  %s1168_s0 = smov 64  }
  0x11   :  { %72 = vst.msk [vmem:[#allocation3] sm:$0xff] %vm70_vm0, %v1167_v0  ;;  %v1206_v4 = vor.u32 %v950_v2, %v904_v1  ;;  %v948_v5 = vld [vmem:[#allocation7 + $0x24] sm:$0xf0]  ;;  %v949_v6 = vld [vmem:[#allocation7 + $0x34] sm:$0xf]  ;;  %v75_v28 = vld [vmem:[#allocation4] sm:$0xff] }
  0x12   :  { %v906_v7 = vld [vmem:[#allocation7 + $0x38] sm:$0xf0]  ;;  %v1209_v8 = vor.u32 %v948_v5, %v896_v3  ;;  %v947_v10 = vld [vmem:[#allocation7 + $0x24] sm:$0xf]  ;;  %v898_v11 = vld [vmem:[#allocation7 + $0x28] sm:$0xf0] }
  0x13   :  { %134 = vmatpush.bf16.msra.mxu0 %v1206_v4  ;;  %v1211_v9 = vor.u32 %v949_v6, %v906_v7  ;;  %224 = vmatpush.bf16.msra.mxu2 %v1206_v4  ;;  %v888_v12 = vld [vmem:[#allocation7 + $0x10] sm:$0xf]  ;;  %v946_v13 = vld [vmem:[#allocation7 + $0x14] sm:$0xf0]  ;;  %v1215_v14 = vor.u32 %v947_v10, %v898_v11  ;;  %v945_v16 = vld [vmem:[#allocation7 + $0x14] sm:$0xf] }
  0x14   :  { %v890_v17 = vld [vmem:[#allocation7 + $0x18] sm:$0xf0]  ;;  %v1220_v18 = vor.u32 %v946_v13, %v888_v12  ;;  %v880_v19 = vld [vmem:[#allocation7] sm:$0xf]  ;;  %v944_v20 = vld [vmem:[#allocation7 + $0x4] sm:$0xf0] }
  0x15   :  { %147 = vmatpush.bf16.msra.mxu1 %v1211_v9  ;;  %237 = vmatpush.bf16.msra.mxu3 %v1211_v9  ;;  %v1224_v21 = vor.u32 %v945_v16, %v890_v17  ;;  %v943_v22 = vld [vmem:[#allocation7 + $0x4] sm:$0xf]  ;;  %v882_v23 = vld [vmem:[#allocation7 + $0x8] sm:$0xf0]  ;;  %v1228_v24 = vor.u32 %v944_v20, %v880_v19  ;;  %v211_v11 = vld [vmem:[#allocation4 + $0x10] sm:$0xff]  ;;  %s1169_s8 = smov [#allocation10]  }
  0x16   :  { %v1232_v26 = vor.u32 %v943_v22, %v882_v23  ;;  %v76_v37 = vld [vmem:[#allocation4 + $0x8] sm:$0xff]  ;;  %v212_v23 = vld [vmem:[#allocation4 + $0x18] sm:$0xff]  ;;  %s865_s9 = sshll.u32 %s1169_s8, 4  ;;  %s867_s12 = sshll.u32 %s1345_s4, 4  ;;  %s866_s9 = int_to_ptr.vmem [resolvable:$true] %s865_s9  ;;  %s868_s12 = int_to_ptr.hbm [resolvable:$true] %s867_s12 }
  0x17   :  { %135 = vmatpush.bf16.msra.mxu0 %v1209_v8  ;;  %225 = vmatpush.bf16.msra.mxu2 %v1209_v8  ;;  %v73_v25 = vld [vmem:[#allocation2] sm:$0xff] }
  0x18   :  { %v74_v15 = vld [vmem:[#allocation3] sm:$0xff]  ;;  %v77_v27 = vpack.c.bf16 %v73_v25, %v73_v25 }
  0x19   :  { %198 = vrot.lane.b32.xlu0 %v74_v15, %s1168_s0  ;;  %148 = vmatpush.bf16.msra.mxu1 %v1215_v14 }
  0x1a   :  { %238 = vmatpush.bf16.msra.mxu3 %v1215_v14 }
  0x1b   :  { %136 = vmatpush.bf16.msra.mxu0 %v1220_v18  ;;  %226 = vmatpush.bf16.msra.mxu2 %v1220_v18 }
  0x1d   :  { %149 = vmatpush.bf16.msra.mxu1 %v1224_v21 }
  0x1e   :  { %239 = vmatpush.bf16.msra.mxu3 %v1224_v21 }
  0x1f   :  { %137 = vmatpush.bf16.msra.mxu0 %v1228_v24  ;;  %227 = vmatpush.bf16.msra.mxu2 %v1228_v24 }
  0x21   :  { %150 = vmatpush.bf16.msra.mxu1 %v1232_v26 }
  0x22   :  { %240 = vmatpush.bf16.msra.mxu3 %v1232_v26  ;;  %910 = vmatmul.msk.bf16.vlgmr.msra.gmra.mxu0 %vm70_vm0, %v77_v27 }
  0x23   :  { %310 = vmatpush.bf16.msrb.mxu0 %v1206_v4  ;;  %396 = vmatpush.bf16.msrb.mxu2 %v1206_v4 }
  0x24   :  { %911 = vmatmul.msk.bf16.vlgmr.msra.gmra.mxu1 %vm70_vm0, %v77_v27 }
  0x25   :  { %323 = vmatpush.bf16.msrb.mxu1 %v1211_v9 }
  0x26   :  { %409 = vmatpush.bf16.msrb.mxu3 %v1211_v9 }
  0x27   :  { %311 = vmatpush.bf16.msrb.mxu0 %v1209_v8  ;;  %397 = vmatpush.bf16.msrb.mxu2 %v1209_v8 }
  0x29   :  { %324 = vmatpush.bf16.msrb.mxu1 %v1215_v14 }
  0x2a   :  { %410 = vmatpush.bf16.msrb.mxu3 %v1215_v14 }
  0x2b   :  { %312 = vmatpush.bf16.msrb.mxu0 %v1220_v18  ;;  %398 = vmatpush.bf16.msrb.mxu2 %v1220_v18 }
  0x2d   :  { %325 = vmatpush.bf16.msrb.mxu1 %v1224_v21 }
  0x2e   :  { %411 = vmatpush.bf16.msrb.mxu3 %v1224_v21 }
  0x2f   :  { %313 = vmatpush.bf16.msrb.mxu0 %v1228_v24  ;;  %399 = vmatpush.bf16.msrb.mxu2 %v1228_v24 }
  0x31   :  { %326 = vmatpush.bf16.msrb.mxu1 %v1232_v26 }
  0x32   :  { %412 = vmatpush.bf16.msrb.mxu3 %v1232_v26 }
  0x33   :  { %482 = vmatpush.bf16.msra.mxu0 %v1206_v4 }
  0x35   :  { %495 = vmatpush.bf16.msra.mxu1 %v1211_v9 }
  0x37   :  { %483 = vmatpush.bf16.msra.mxu0 %v1209_v8 }
  0x39   :  { %496 = vmatpush.bf16.msra.mxu1 %v1215_v14 }
  0x3b   :  { %484 = vmatpush.bf16.msra.mxu0 %v1220_v18 }
  0x3d   :  { %497 = vmatpush.bf16.msra.mxu1 %v1224_v21 }
  0x3f   :  { %485 = vmatpush.bf16.msra.mxu0 %v1228_v24 }
  0x41   :  { %498 = vmatpush.bf16.msra.mxu1 %v1232_v26 }
  0x8b   :  { %v199_v56 = vpop.permute.xlu0 %198 }
  0x9f   :  { %v139_v29 = vpop.f32.mrf.mxu0 }
  0xa0   :  { %v156_v30 = vadd.f32 %v139_v29, %v75_v28 }
  0xa1   :  { %v152_v31 = vpop.f32.mrf.mxu1 }
  0xa2   :  { %v912_v32 = vmul.f32 -1.442695, %v156_v30  ;;  %v157_v39 = vadd.f32 %v152_v31, %v76_v37 }
  0xa4   :  { %962 = vpow2.f32 %v912_v32  ;;  %v913_v51 = vmul.f32 -1.442695, %v157_v39 }
  0xa7   :  { %v141_v33 = vpop.f32.mrf.mxu0 }
  0xa9   :  { %v154_v34 = vpop.f32.mrf.mxu1 }
  0xaa   :  { %v963_v35 = vpop.eup %962 }
  0xab   :  { %v161_v36 = vadd.f32 1.0, %v963_v35 }
  0xad   :  { %964 = vrcp.f32 %v161_v36  ;;  %v173_v42 = vand.u32 2147483648, %v161_v36  ;;  %v171_v44 = vand.u32 2147483647, %v161_v36  ;;  %vm167_vm2 = vweird.f32 %v161_v36 }
  0xae   :  { %966 = vtanh.f32 %v157_v39 }
  0xaf   :  { %v174_v47 = vor.u32 1.1754944e-38, %v173_v42  ;;  %vm172_vm4 = vcmp.eq.f32.partialorder %v171_v44, 8.507059e+37  ;;  %968 = vpow2.f32 %v913_v51 }
  0xb3   :  { %v965_v38 = vpop.eup %964 }
  0xb4   :  { %v163_v40 = vmul.f32 %v965_v38, %v161_v36  ;;  %vm168_vm1 = vweird.f32 %v965_v38  ;;  %v967_v46 = vpop.eup %966 }
  0xb5   :  { %vm169_vm3 = vmor %vm167_vm2, %vm168_vm1  ;;  %v969_v52 = vpop.eup %968 }
  0xb6   :  { %v164_v41 = vsub.f32 1.0, %v163_v40  ;;  %v181_v53 = vadd.f32 1.0, %v969_v52 }
  0xb8   :  { %v165_v43 = vmul.f32 %v965_v38, %v164_v41  ;;  %970 = vrcp.f32 %v181_v53  ;;  %vm187_vm5 = vweird.f32 %v181_v53  ;;  %v193_v62 = vand.u32 2147483648, %v181_v53 }
  0xb9   :  { %v191_v0 = vand.u32 2147483647, %v181_v53 }
  0xba   :  { %v166_v45 = vadd.f32 %v965_v38, %v165_v43  ;;  %v194_v1 = vor.u32 1.1754944e-38, %v193_v62 }
  0xbb   :  { %vm192_vm8 = vcmp.eq.f32.partialorder %v191_v0, 8.507059e+37 }
  0xbc   :  { %v170_v48 = vsel %vm169_vm3, %v965_v38, %v166_v45 }
  0xbd   :  { %v175_v49 = vsel %vm172_vm4, %v174_v47, %v170_v48 }
  0xbe   :  { %v202_v50 = vmul.f32 %v967_v46, %v175_v49  ;;  %v971_v54 = vpop.eup %970  ;;  %v201_v59 = vmul.f32 %v199_v56, %v175_v49 }
  0xbf   :  { %v183_v55 = vmul.f32 %v971_v54, %v181_v53  ;;  %vm188_vm6 = vweird.f32 %v971_v54 }
  0xc0   :  { %204 = vrot.lane.b32.xlu0 %v202_v50, %s1168_s0  ;;  %vm189_vm7 = vmor %vm187_vm5, %vm188_vm6 }
  0xc1   :  { %v184_v57 = vsub.f32 1.0, %v183_v55 }
  0xc3   :  { %v185_v58 = vmul.f32 %v971_v54, %v184_v57 }
  0xc5   :  { %v186_v63 = vadd.f32 %v971_v54, %v185_v58 }
  0xc7   :  { %v190_v2 = vsel %vm189_vm7, %v971_v54, %v186_v63 }
  0xc8   :  { %v195_v5 = vsel %vm192_vm8, %v194_v1, %v190_v2 }
 0x132   :  { %v205_v60 = vpop.permute.xlu0 %204 }
 0x133   :  { %v1266_v61 = vadd.f32 %v205_v60, %v201_v59  ;;  %v297_v59 = vld [vmem:[#allocation4 + $0x20] sm:$0xff] }
 0x135   :  { %972 = vtanh.f32 %v1266_v61 }
 0x13b   :  { %v973_v3 = vpop.eup %972 }
 0x13c   :  { %v209_v6 = vmul.f32 %v973_v3, %v195_v5  ;;  %v298_v5 = vld [vmem:[#allocation4 + $0x28] sm:$0xff] }
 0x13e   :  { %v213_v7 = vpack.c.bf16 %v209_v6, %v209_v6 }
 0x140   :  { %215 = vrot.lane.b32.xlu1 %v213_v7, %s1168_s0 }
 0x1b2   :  { %v216_v10 = vpop.permute.xlu1 %215 }
 0x1b3   :  { %914 = vmatmul.msk.bf16.vlgmr.msra.gmra.mxu2 %vm70_vm0, %v216_v10  ;;  %915 = vmatmul.msk.bf16.vlgmr.msra.gmra.mxu3 %vm70_vm0, %v216_v10 }
 0x1b4   :  { %568 = vmatpush.bf16.msra.mxu2 %v1206_v4  ;;  %581 = vmatpush.bf16.msra.mxu3 %v1211_v9 }
 0x1b8   :  { %569 = vmatpush.bf16.msra.mxu2 %v1209_v8  ;;  %582 = vmatpush.bf16.msra.mxu3 %v1215_v14 }
 0x1bc   :  { %570 = vmatpush.bf16.msra.mxu2 %v1220_v18  ;;  %583 = vmatpush.bf16.msra.mxu3 %v1224_v21 }
 0x1c0   :  { %571 = vmatpush.bf16.msra.mxu2 %v1228_v24  ;;  %584 = vmatpush.bf16.msra.mxu3 %v1232_v26 }
 0x236   :  { %v229_v12 = vpop.f32.mrf.mxu2  ;;  %v242_v13 = vpop.f32.mrf.mxu3 }
 0x237   :  { %v246_v15 = vadd.f32 %v229_v12, %v211_v11  ;;  %v247_v27 = vadd.f32 %v242_v13, %v212_v23 }
 0x239   :  { %v916_v16 = vmul.f32 -1.442695, %v246_v15  ;;  %v917_v39 = vmul.f32 -1.442695, %v247_v27 }
 0x23b   :  { %974 = vpow2.f32 %v916_v16 }
 0x23e   :  { %v231_v17 = vpop.f32.mrf.mxu2  ;;  %v244_v19 = vpop.f32.mrf.mxu3 }
 0x241   :  { %v975_v20 = vpop.eup %974 }
 0x242   :  { %v251_v22 = vadd.f32 1.0, %v975_v20 }
 0x244   :  { %976 = vrcp.f32 %v251_v22  ;;  %v263_v30 = vand.u32 2147483648, %v251_v22  ;;  %v261_v32 = vand.u32 2147483647, %v251_v22  ;;  %vm257_vm10 = vweird.f32 %v251_v22 }
 0x245   :  { %978 = vtanh.f32 %v247_v27 }
 0x246   :  { %v264_v34 = vor.u32 1.1754944e-38, %v263_v30  ;;  %vm262_vm12 = vcmp.eq.f32.partialorder %v261_v32, 8.507059e+37  ;;  %980 = vpow2.f32 %v917_v39 }
 0x24a   :  { %v977_v25 = vpop.eup %976 }
 0x24b   :  { %v253_v28 = vmul.f32 %v977_v25, %v251_v22  ;;  %vm258_vm9 = vweird.f32 %v977_v25  ;;  %v979_v36 = vpop.eup %978 }
 0x24c   :  { %vm259_vm11 = vmor %vm257_vm10, %vm258_vm9  ;;  %v981_v40 = vpop.eup %980 }
 0x24d   :  { %v254_v29 = vsub.f32 1.0, %v253_v28  ;;  %v271_v41 = vadd.f32 1.0, %v981_v40 }
 0x24f   :  { %v255_v31 = vmul.f32 %v977_v25, %v254_v29  ;;  %982 = vrcp.f32 %v271_v41  ;;  %v283_v50 = vand.u32 2147483648, %v271_v41  ;;  %vm277_vm14 = vweird.f32 %v271_v41 }
 0x250   :  { %v281_v51 = vand.u32 2147483647, %v271_v41 }
 0x251   :  { %v256_v33 = vadd.f32 %v977_v25, %v255_v31  ;;  %v284_v53 = vor.u32 1.1754944e-38, %v283_v50 }
 0x252   :  { %vm282_vm1 = vcmp.eq.f32.partialorder %v281_v51, 8.507059e+37 }
 0x253   :  { %v260_v35 = vsel %vm259_vm11, %v977_v25, %v256_v33 }
 0x254   :  { %v265_v37 = vsel %vm262_vm12, %v264_v34, %v260_v35 }
 0x255   :  { %v288_v38 = vmul.f32 %v979_v36, %v265_v37  ;;  %v983_v42 = vpop.eup %982  ;;  %v287_v46 = vmul.f32 %v265_v37, %v1266_v61 }
 0x256   :  { %v273_v43 = vmul.f32 %v983_v42, %v271_v41  ;;  %vm278_vm13 = vweird.f32 %v983_v42 }
 0x257   :  { %290 = vrot.lane.b32.xlu1 %v288_v38, %s1168_s0  ;;  %vm279_vm15 = vmor %vm277_vm14, %vm278_vm13 }
 0x258   :  { %v274_v44 = vsub.f32 1.0, %v273_v43 }
 0x25a   :  { %v275_v45 = vmul.f32 %v983_v42, %v274_v44 }
 0x25c   :  { %v276_v49 = vadd.f32 %v983_v42, %v275_v45 }
 0x25e   :  { %v280_v52 = vsel %vm279_vm15, %v983_v42, %v276_v49 }
 0x25f   :  { %v285_v55 = vsel %vm282_vm1, %v284_v53, %v280_v52 }
 0x2c9   :  { %v291_v47 = vpop.permute.xlu1 %290 }
 0x2ca   :  { %v1282_v48 = vadd.f32 %v291_v47, %v287_v46  ;;  %v383_v46 = vld [vmem:[#allocation4 + $0x30] sm:$0xff] }
 0x2cc   :  { %984 = vtanh.f32 %v1282_v48 }
 0x2d2   :  { %v985_v54 = vpop.eup %984 }
 0x2d3   :  { %v295_v56 = vmul.f32 %v985_v54, %v285_v55 }
 0x2d5   :  { %v299_v57 = vpack.c.bf16 %v295_v56, %v295_v56 }
 0x2d7   :  { %301 = vrot.lane.b32.xlu2 %v299_v57, %s1168_s0 }
 0x331   :  { %v302_v58 = vpop.permute.xlu2 %301 }
 0x332   :  { %918 = vmatmul.msk.bf16.vlgmr.msrb.gmra.mxu0 %vm70_vm0, %v302_v58  ;;  %919 = vmatmul.msk.bf16.vlgmr.msrb.gmra.mxu1 %vm70_vm0, %v302_v58 }
 0x333   :  { %654 = vmatpush.bf16.msrb.mxu0 %v1206_v4  ;;  %667 = vmatpush.bf16.msrb.mxu1 %v1211_v9 }
 0x337   :  { %655 = vmatpush.bf16.msrb.mxu0 %v1209_v8  ;;  %668 = vmatpush.bf16.msrb.mxu1 %v1215_v14 }
 0x33b   :  { %656 = vmatpush.bf16.msrb.mxu0 %v1220_v18  ;;  %669 = vmatpush.bf16.msrb.mxu1 %v1224_v21 }
 0x33f   :  { %657 = vmatpush.bf16.msrb.mxu0 %v1228_v24  ;;  %670 = vmatpush.bf16.msrb.mxu1 %v1232_v26 }
 0x3af   :  { %v315_v60 = vpop.f32.mrf.mxu0  ;;  %v328_v61 = vpop.f32.mrf.mxu1 }
 0x3b0   :  { %v332_v62 = vadd.f32 %v315_v60, %v297_v59  ;;  %v333_v7 = vadd.f32 %v328_v61, %v298_v5 }
 0x3b2   :  { %v920_v63 = vmul.f32 -1.442695, %v332_v62  ;;  %v921_v25 = vmul.f32 -1.442695, %v333_v7 }
 0x3b4   :  { %986 = vpow2.f32 %v920_v63 }
 0x3b7   :  { %v317_v0 = vpop.f32.mrf.mxu0  ;;  %v330_v1 = vpop.f32.mrf.mxu1 }
 0x3ba   :  { %v987_v2 = vpop.eup %986 }
 0x3bb   :  { %v337_v3 = vadd.f32 1.0, %v987_v2 }
 0x3bd   :  { %988 = vrcp.f32 %v337_v3  ;;  %v349_v12 = vand.u32 2147483648, %v337_v3  ;;  %v347_v15 = vand.u32 2147483647, %v337_v3  ;;  %vm343_vm3 = vweird.f32 %v337_v3 }
 0x3be   :  { %990 = vtanh.f32 %v333_v7 }
 0x3bf   :  { %v350_v17 = vor.u32 1.1754944e-38, %v349_v12  ;;  %vm348_vm5 = vcmp.eq.f32.partialorder %v347_v15, 8.507059e+37  ;;  %992 = vpow2.f32 %v921_v25 }
 0x3c3   :  { %v989_v6 = vpop.eup %988 }
 0x3c4   :  { %v339_v10 = vmul.f32 %v989_v6, %v337_v3  ;;  %vm344_vm2 = vweird.f32 %v989_v6  ;;  %v991_v20 = vpop.eup %990 }
 0x3c5   :  { %vm345_vm4 = vmor %vm343_vm3, %vm344_vm2  ;;  %v993_v27 = vpop.eup %992 }
 0x3c6   :  { %v340_v11 = vsub.f32 1.0, %v339_v10  ;;  %v357_v28 = vadd.f32 1.0, %v993_v27 }
 0x3c8   :  { %v341_v13 = vmul.f32 %v989_v6, %v340_v11  ;;  %994 = vrcp.f32 %v357_v28  ;;  %v369_v37 = vand.u32 2147483648, %v357_v28  ;;  %vm363_vm7 = vweird.f32 %v357_v28 }
 0x3c9   :  { %v367_v38 = vand.u32 2147483647, %v357_v28 }
 0x3ca   :  { %v342_v16 = vadd.f32 %v989_v6, %v341_v13  ;;  %v370_v40 = vor.u32 1.1754944e-38, %v369_v37 }
 0x3cb   :  { %vm368_vm9 = vcmp.eq.f32.partialorder %v367_v38, 8.507059e+37 }
 0x3cc   :  { %v346_v19 = vsel %vm345_vm4, %v989_v6, %v342_v16 }
 0x3cd   :  { %v351_v22 = vsel %vm348_vm5, %v350_v17, %v346_v19 }
 0x3ce   :  { %v374_v23 = vmul.f32 %v991_v20, %v351_v22  ;;  %v995_v29 = vpop.eup %994  ;;  %v373_v33 = vmul.f32 %v351_v22, %v1282_v48 }
 0x3cf   :  { %v359_v30 = vmul.f32 %v995_v29, %v357_v28  ;;  %vm364_vm6 = vweird.f32 %v995_v29 }
 0x3d0   :  { %376 = vrot.lane.b32.xlu2 %v374_v23, %s1168_s0  ;;  %vm365_vm8 = vmor %vm363_vm7, %vm364_vm6  ;;  %v469_v23 = vld [vmem:[#allocation4 + $0x40] sm:$0xff] }
 0x3d1   :  { %v360_v31 = vsub.f32 1.0, %v359_v30 }
 0x3d3   :  { %v361_v32 = vmul.f32 %v995_v29, %v360_v31 }
 0x3d5   :  { %v362_v36 = vadd.f32 %v995_v29, %v361_v32 }
 0x3d7   :  { %v366_v39 = vsel %vm365_vm8, %v995_v29, %v362_v36 }
 0x3d8   :  { %v371_v42 = vsel %vm368_vm9, %v370_v40, %v366_v39 }
 0x42a   :  { %v377_v34 = vpop.permute.xlu2 %376 }
 0x42b   :  { %v1298_v35 = vadd.f32 %v377_v34, %v373_v33  ;;  %v470_v34 = vld [vmem:[#allocation4 + $0x48] sm:$0xff] }
 0x42d   :  { %996 = vtanh.f32 %v1298_v35 }
 0x433   :  { %v997_v41 = vpop.eup %996 }
 0x434   :  { %v381_v43 = vmul.f32 %v997_v41, %v371_v42 }
 0x436   :  { %v385_v44 = vpack.c.bf16 %v381_v43, %v381_v43 }
 0x438   :  { %387 = vrot.lane.b32.xlu0 %v385_v44, %s1168_s0 }
 0x4aa   :  { %v388_v45 = vpop.permute.xlu0 %387 }
 0x4ab   :  { %922 = vmatmul.msk.bf16.vlgmr.msrb.gmra.mxu2 %vm70_vm0, %v388_v45  ;;  %923 = vmatmul.msk.bf16.vlgmr.msrb.gmra.mxu3 %vm70_vm0, %v388_v45 }
 0x4ac   :  { %740 = vmatpush.bf16.msrb.mxu2 %v1206_v4  ;;  %753 = vmatpush.bf16.msrb.mxu3 %v1211_v9 }
 0x4b0   :  { %741 = vmatpush.bf16.msrb.mxu2 %v1209_v8  ;;  %754 = vmatpush.bf16.msrb.mxu3 %v1215_v14  ;;  %v384_v14 = vld [vmem:[#allocation4 + $0x38] sm:$0xff] }
 0x4b4   :  { %742 = vmatpush.bf16.msrb.mxu2 %v1220_v18  ;;  %755 = vmatpush.bf16.msrb.mxu3 %v1224_v21 }
 0x4b8   :  { %743 = vmatpush.bf16.msrb.mxu2 %v1228_v24  ;;  %756 = vmatpush.bf16.msrb.mxu3 %v1232_v26 }
 0x52e   :  { %v401_v47 = vpop.f32.mrf.mxu2  ;;  %v414_v48 = vpop.f32.mrf.mxu3 }
 0x52f   :  { %v418_v49 = vadd.f32 %v401_v47, %v383_v46  ;;  %v419_v18 = vadd.f32 %v414_v48, %v384_v14 }
 0x531   :  { %v924_v50 = vmul.f32 -1.442695, %v418_v49  ;;  %v925_v61 = vmul.f32 -1.442695, %v419_v18 }
 0x533   :  { %998 = vpow2.f32 %v924_v50 }
 0x536   :  { %v403_v4 = vpop.f32.mrf.mxu2  ;;  %v416_v9 = vpop.f32.mrf.mxu3 }
 0x539   :  { %v999_v51 = vpop.eup %998 }
 0x53a   :  { %v423_v8 = vadd.f32 1.0, %v999_v51 }
 0x53c   :  { %1000 = vrcp.f32 %v423_v8  ;;  %v435_v24 = vand.u32 2147483648, %v423_v8  ;;  %v433_v26 = vand.u32 2147483647, %v423_v8  ;;  %vm429_vm11 = vweird.f32 %v423_v8 }
 0x53d   :  { %1002 = vtanh.f32 %v419_v18 }
 0x53e   :  { %v436_v56 = vor.u32 1.1754944e-38, %v435_v24  ;;  %vm434_vm13 = vcmp.eq.f32.partialorder %v433_v26, 8.507059e+37  ;;  %1004 = vpow2.f32 %v925_v61 }
 0x542   :  { %v1001_v52 = vpop.eup %1000 }
 0x543   :  { %v425_v53 = vmul.f32 %v1001_v52, %v423_v8  ;;  %vm430_vm10 = vweird.f32 %v1001_v52  ;;  %v1003_v58 = vpop.eup %1002 }
 0x544   :  { %vm431_vm12 = vmor %vm429_vm11, %vm430_vm10  ;;  %v1005_v62 = vpop.eup %1004 }
 0x545   :  { %v426_v21 = vsub.f32 1.0, %v425_v53  ;;  %v443_v63 = vadd.f32 1.0, %v1005_v62 }
 0x547   :  { %v427_v54 = vmul.f32 %v1001_v52, %v426_v21  ;;  %1006 = vrcp.f32 %v443_v63  ;;  %v455_v11 = vand.u32 2147483648, %v443_v63  ;;  %vm449_vm15 = vweird.f32 %v443_v63 }
 0x548   :  { %v453_v12 = vand.u32 2147483647, %v443_v63 }
 0x549   :  { %v428_v55 = vadd.f32 %v1001_v52, %v427_v54  ;;  %v456_v15 = vor.u32 1.1754944e-38, %v455_v11 }
 0x54a   :  { %vm454_vm2 = vcmp.eq.f32.partialorder %v453_v12, 8.507059e+37 }
 0x54b   :  { %v432_v57 = vsel %vm431_vm12, %v1001_v52, %v428_v55 }
 0x54c   :  { %v437_v59 = vsel %vm434_vm13, %v436_v56, %v432_v57 }
 0x54d   :  { %v460_v60 = vmul.f32 %v1003_v58, %v437_v59  ;;  %v1007_v0 = vpop.eup %1006  ;;  %v459_v5 = vmul.f32 %v437_v59, %v1298_v35 }
 0x54e   :  { %v445_v1 = vmul.f32 %v1007_v0, %v443_v63  ;;  %vm450_vm14 = vweird.f32 %v1007_v0 }
 0x54f   :  { %462 = vrot.lane.b32.xlu1 %v460_v60, %s1168_s0  ;;  %vm451_vm1 = vmor %vm449_vm15, %vm450_vm14  ;;  %v555_v60 = vld [vmem:[#allocation4 + $0x50] sm:$0xff] }
 0x550   :  { %v446_v2 = vsub.f32 1.0, %v445_v1 }
 0x552   :  { %v447_v3 = vmul.f32 %v1007_v0, %v446_v2 }
 0x554   :  { %v448_v10 = vadd.f32 %v1007_v0, %v447_v3 }
 0x556   :  { %v452_v13 = vsel %vm451_vm1, %v1007_v0, %v448_v10 }
 0x557   :  { %v457_v17 = vsel %vm454_vm2, %v456_v15, %v452_v13 }
 0x5c1   :  { %v463_v6 = vpop.permute.xlu1 %462 }
 0x5c2   :  { %v465_v7 = vadd.f32 %v463_v6, %v459_v5  ;;  %v556_v6 = vld [vmem:[#allocation4 + $0x58] sm:$0xff] }
 0x5c4   :  { %1008 = vtanh.f32 %v465_v7 }
 0x5ca   :  { %v1009_v16 = vpop.eup %1008 }
 0x5cb   :  { %v467_v19 = vmul.f32 %v1009_v16, %v457_v17 }
 0x5cd   :  { %v471_v20 = vpack.c.bf16 %v467_v19, %v467_v19 }
 0x5cf   :  { %473 = vrot.lane.b32.xlu2 %v471_v20, %s1168_s0 }
 0x629   :  { %v474_v22 = vpop.permute.xlu2 %473 }
 0x62a   :  { %926 = vmatmul.msk.bf16.vlgmr.msra.gmra.mxu0 %vm70_vm0, %v474_v22  ;;  %927 = vmatmul.msk.bf16.vlgmr.msra.gmra.mxu1 %vm70_vm0, %v474_v22 }
 0x6a7   :  { %v487_v25 = vpop.f32.mrf.mxu0  ;;  %v500_v27 = vpop.f32.mrf.mxu1 }
 0x6a8   :  { %v504_v28 = vadd.f32 %v487_v25, %v469_v23  ;;  %v505_v36 = vadd.f32 %v500_v27, %v470_v34 }
 0x6aa   :  { %v928_v29 = vmul.f32 -1.442695, %v504_v28  ;;  %v929_v48 = vmul.f32 -1.442695, %v505_v36 }
 0x6ac   :  { %1010 = vpow2.f32 %v928_v29 }
 0x6af   :  { %v489_v30 = vpop.f32.mrf.mxu0  ;;  %v502_v31 = vpop.f32.mrf.mxu1 }
 0x6b2   :  { %v1011_v32 = vpop.eup %1010 }
 0x6b3   :  { %v509_v33 = vadd.f32 1.0, %v1011_v32 }
 0x6b5   :  { %1012 = vrcp.f32 %v509_v33  ;;  %v521_v39 = vand.u32 2147483648, %v509_v33  ;;  %v519_v41 = vand.u32 2147483647, %v509_v33  ;;  %vm515_vm4 = vweird.f32 %v509_v33 }
 0x6b6   :  { %1014 = vtanh.f32 %v505_v36 }
 0x6b7   :  { %v522_v43 = vor.u32 1.1754944e-38, %v521_v39  ;;  %vm520_vm6 = vcmp.eq.f32.partialorder %v519_v41, 8.507059e+37  ;;  %1016 = vpow2.f32 %v929_v48 }
 0x6bb   :  { %v1013_v35 = vpop.eup %1012 }
 0x6bc   :  { %v511_v37 = vmul.f32 %v1013_v35, %v509_v33  ;;  %vm516_vm3 = vweird.f32 %v1013_v35  ;;  %v1015_v45 = vpop.eup %1014 }
 0x6bd   :  { %vm517_vm5 = vmor %vm515_vm4, %vm516_vm3  ;;  %v1017_v49 = vpop.eup %1016 }
 0x6be   :  { %v512_v38 = vsub.f32 1.0, %v511_v37  ;;  %v529_v50 = vadd.f32 1.0, %v1017_v49 }
 0x6c0   :  { %v513_v40 = vmul.f32 %v1013_v35, %v512_v38  ;;  %1018 = vrcp.f32 %v529_v50  ;;  %v541_v21 = vand.u32 2147483648, %v529_v50  ;;  %vm535_vm8 = vweird.f32 %v529_v50 }
 0x6c1   :  { %v539_v24 = vand.u32 2147483647, %v529_v50 }
 0x6c2   :  { %v514_v42 = vadd.f32 %v1013_v35, %v513_v40  ;;  %v542_v26 = vor.u32 1.1754944e-38, %v541_v21 }
 0x6c3   :  { %vm540_vm10 = vcmp.eq.f32.partialorder %v539_v24, 8.507059e+37 }
 0x6c4   :  { %v518_v44 = vsel %vm517_vm5, %v1013_v35, %v514_v42 }
 0x6c5   :  { %v523_v46 = vsel %vm520_vm6, %v522_v43, %v518_v44 }
 0x6c6   :  { %v546_v47 = vmul.f32 %v1015_v45, %v523_v46  ;;  %v1019_v4 = vpop.eup %1018  ;;  %v545_v14 = vmul.f32 %v523_v46, %v465_v7 }
 0x6c7   :  { %v531_v9 = vmul.f32 %v1019_v4, %v529_v50  ;;  %vm536_vm7 = vweird.f32 %v1019_v4 }
 0x6c8   :  { %548 = vrot.lane.b32.xlu0 %v546_v47, %s1168_s0  ;;  %vm537_vm9 = vmor %vm535_vm8, %vm536_vm7  ;;  %v641_v47 = vld [vmem:[#allocation4 + $0x60] sm:$0xff] }
 0x6c9   :  { %v532_v51 = vsub.f32 1.0, %v531_v9 }
 0x6cb   :  { %v533_v8 = vmul.f32 %v1019_v4, %v532_v51 }
 0x6cd   :  { %v534_v53 = vadd.f32 %v1019_v4, %v533_v8 }
 0x6cf   :  { %v538_v54 = vsel %vm537_vm9, %v1019_v4, %v534_v53 }
 0x6d0   :  { %v543_v56 = vsel %vm540_vm10, %v542_v26, %v538_v54 }
 0x73a   :  { %v549_v52 = vpop.permute.xlu0 %548 }
 0x73b   :  { %v551_v18 = vadd.f32 %v549_v52, %v545_v14  ;;  %v642_v52 = vld [vmem:[#allocation4 + $0x68] sm:$0xff] }
 0x73d   :  { %1020 = vtanh.f32 %v551_v18 }
 0x743   :  { %v1021_v55 = vpop.eup %1020 }
 0x744   :  { %v553_v57 = vmul.f32 %v1021_v55, %v543_v56 }
 0x746   :  { %v557_v58 = vpack.c.bf16 %v553_v57, %v553_v57 }
 0x748   :  { %559 = vrot.lane.b32.xlu1 %v557_v58, %s1168_s0 }
 0x7ba   :  { %v560_v59 = vpop.permute.xlu1 %559 }
 0x7bb   :  { %930 = vmatmul.msk.bf16.vlgmr.msra.gmra.mxu2 %vm70_vm0, %v560_v59  ;;  %931 = vmatmul.msk.bf16.vlgmr.msra.gmra.mxu3 %vm70_vm0, %v560_v59 }
 0x83e   :  { %v573_v61 = vpop.f32.mrf.mxu2  ;;  %v586_v62 = vpop.f32.mrf.mxu3 }
 0x83f   :  { %v590_v63 = vadd.f32 %v573_v61, %v555_v60  ;;  %v591_v10 = vadd.f32 %v586_v62, %v556_v6 }
 0x841   :  { %v932_v0 = vmul.f32 -1.442695, %v590_v63  ;;  %v933_v27 = vmul.f32 -1.442695, %v591_v10 }
 0x843   :  { %1022 = vpow2.f32 %v932_v0 }
 0x846   :  { %v575_v1 = vpop.f32.mrf.mxu2  ;;  %v588_v2 = vpop.f32.mrf.mxu3 }
 0x849   :  { %v1023_v3 = vpop.eup %1022 }
 0x84a   :  { %v595_v5 = vadd.f32 1.0, %v1023_v3 }
 0x84c   :  { %1024 = vrcp.f32 %v595_v5  ;;  %v607_v13 = vand.u32 2147483648, %v595_v5  ;;  %v605_v16 = vand.u32 2147483647, %v595_v5  ;;  %vm601_vm12 = vweird.f32 %v595_v5 }
 0x84d   :  { %1026 = vtanh.f32 %v591_v10 }
 0x84e   :  { %v608_v19 = vor.u32 1.1754944e-38, %v607_v13  ;;  %vm606_vm14 = vcmp.eq.f32.partialorder %v605_v16, 8.507059e+37  ;;  %1028 = vpow2.f32 %v933_v27 }
 0x852   :  { %v1025_v7 = vpop.eup %1024 }
 0x853   :  { %v597_v11 = vmul.f32 %v1025_v7, %v595_v5  ;;  %vm602_vm11 = vweird.f32 %v1025_v7  ;;  %v1027_v22 = vpop.eup %1026 }
 0x854   :  { %vm603_vm13 = vmor %vm601_vm12, %vm602_vm11  ;;  %v1029_v28 = vpop.eup %1028 }
 0x855   :  { %v598_v12 = vsub.f32 1.0, %v597_v11  ;;  %v615_v29 = vadd.f32 1.0, %v1029_v28 }
 0x857   :  { %v599_v15 = vmul.f32 %v1025_v7, %v598_v12  ;;  %1030 = vrcp.f32 %v615_v29  ;;  %v627_v38 = vand.u32 2147483648, %v615_v29  ;;  %vm621_vm1 = vweird.f32 %v615_v29 }
 0x858   :  { %v625_v39 = vand.u32 2147483647, %v615_v29 }
 0x859   :  { %v600_v17 = vadd.f32 %v1025_v7, %v599_v15  ;;  %v628_v41 = vor.u32 1.1754944e-38, %v627_v38 }
 0x85a   :  { %vm626_vm3 = vcmp.eq.f32.partialorder %v625_v39, 8.507059e+37 }
 0x85b   :  { %v604_v20 = vsel %vm603_vm13, %v1025_v7, %v600_v17 }
 0x85c   :  { %v609_v23 = vsel %vm606_vm14, %v608_v19, %v604_v20 }
 0x85d   :  { %v632_v25 = vmul.f32 %v1027_v22, %v609_v23  ;;  %v1031_v30 = vpop.eup %1030  ;;  %v631_v34 = vmul.f32 %v609_v23, %v551_v18 }
 0x85e   :  { %v617_v31 = vmul.f32 %v1031_v30, %v615_v29  ;;  %vm622_vm15 = vweird.f32 %v1031_v30 }
 0x85f   :  { %634 = vrot.lane.b32.xlu2 %v632_v25, %s1168_s0  ;;  %vm623_vm2 = vmor %vm621_vm1, %vm622_vm15  ;;  %v727_v25 = vld [vmem:[#allocation4 + $0x70] sm:$0xff] }
 0x860   :  { %v618_v32 = vsub.f32 1.0, %v617_v31 }
 0x862   :  { %v619_v33 = vmul.f32 %v1031_v30, %v618_v32 }
 0x864   :  { %v620_v37 = vadd.f32 %v1031_v30, %v619_v33 }
 0x866   :  { %v624_v40 = vsel %vm623_vm2, %v1031_v30, %v620_v37 }
 0x867   :  { %v629_v43 = vsel %vm626_vm3, %v628_v41, %v624_v40 }
 0x8b9   :  { %v635_v35 = vpop.permute.xlu2 %634 }
 0x8ba   :  { %v637_v36 = vadd.f32 %v635_v35, %v631_v34  ;;  %v728_v35 = vld [vmem:[#allocation4 + $0x78] sm:$0xff] }
 0x8bc   :  { %1032 = vtanh.f32 %v637_v36 }
 0x8c2   :  { %v1033_v42 = vpop.eup %1032 }
 0x8c3   :  { %v639_v44 = vmul.f32 %v1033_v42, %v629_v43 }
 0x8c5   :  { %v643_v45 = vpack.c.bf16 %v639_v44, %v639_v44 }
 0x8c7   :  { %645 = vrot.lane.b32.xlu0 %v643_v45, %s1168_s0 }
 0x939   :  { %v646_v46 = vpop.permute.xlu0 %645 }
 0x93a   :  { %934 = vmatmul.msk.bf16.vlgmr.msrb.gmra.mxu0 %vm70_vm0, %v646_v46  ;;  %935 = vmatmul.msk.bf16.vlgmr.msrb.gmra.mxu1 %vm70_vm0, %v646_v46 }
 0x9b7   :  { %v659_v48 = vpop.f32.mrf.mxu0  ;;  %v672_v49 = vpop.f32.mrf.mxu1 }
 0x9b8   :  { %v676_v50 = vadd.f32 %v659_v48, %v641_v47  ;;  %v677_v53 = vadd.f32 %v672_v49, %v642_v52 }
 0x9ba   :  { %v936_v4 = vmul.f32 -1.442695, %v676_v50  ;;  %v937_v62 = vmul.f32 -1.442695, %v677_v53 }
 0x9bc   :  { %1034 = vpow2.f32 %v936_v4 }
 0x9bf   :  { %v661_v9 = vpop.f32.mrf.mxu0  ;;  %v674_v51 = vpop.f32.mrf.mxu1 }
 0x9c2   :  { %v1035_v8 = vpop.eup %1034 }
 0x9c3   :  { %v681_v14 = vadd.f32 1.0, %v1035_v8 }
 0x9c5   :  { %1036 = vrcp.f32 %v681_v14  ;;  %v693_v54 = vand.u32 2147483648, %v681_v14  ;;  %v691_v55 = vand.u32 2147483647, %v681_v14  ;;  %vm687_vm5 = vweird.f32 %v681_v14 }
 0x9c6   :  { %1038 = vtanh.f32 %v677_v53 }
 0x9c7   :  { %v694_v57 = vor.u32 1.1754944e-38, %v693_v54  ;;  %vm692_vm7 = vcmp.eq.f32.partialorder %v691_v55, 8.507059e+37  ;;  %1040 = vpow2.f32 %v937_v62  ;;  %v829_v62 = vld [vmem:[#allocation9 + $0x20] sm:$0xff] }
 0x9cb   :  { %v1037_v18 = vpop.eup %1036 }
 0x9cc   :  { %v683_v21 = vmul.f32 %v1037_v18, %v681_v14  ;;  %vm688_vm4 = vweird.f32 %v1037_v18  ;;  %v1039_v59 = vpop.eup %1038 }
 0x9cd   :  { %vm689_vm6 = vmor %vm687_vm5, %vm688_vm4  ;;  %v1041_v63 = vpop.eup %1040 }
 0x9ce   :  { %v684_v24 = vsub.f32 1.0, %v683_v21  ;;  %v701_v0 = vadd.f32 1.0, %v1041_v63  ;;  %v828_v63 = vld [vmem:[#allocation9 + $0x18] sm:$0xff] }
 0x9d0   :  { %v685_v26 = vmul.f32 %v1037_v18, %v684_v24  ;;  %1042 = vrcp.f32 %v701_v0  ;;  %v713_v12 = vand.u32 2147483648, %v701_v0  ;;  %vm707_vm9 = vweird.f32 %v701_v0 }
 0x9d1   :  { %v711_v13 = vand.u32 2147483647, %v701_v0 }
 0x9d2   :  { %v686_v56 = vadd.f32 %v1037_v18, %v685_v26  ;;  %v714_v16 = vor.u32 1.1754944e-38, %v713_v12 }
 0x9d3   :  { %vm712_vm11 = vcmp.eq.f32.partialorder %v711_v13, 8.507059e+37 }
 0x9d4   :  { %v690_v58 = vsel %vm689_vm6, %v1037_v18, %v686_v56 }
 0x9d5   :  { %v695_v60 = vsel %vm692_vm7, %v694_v57, %v690_v58 }
 0x9d6   :  { %v718_v61 = vmul.f32 %v1039_v59, %v695_v60  ;;  %v1043_v1 = vpop.eup %1042  ;;  %v717_v6 = vmul.f32 %v695_v60, %v637_v36  ;;  %v832_v59 = vld [vmem:[#allocation9 + $0x38] sm:$0xff]  ;;  %v831_v60 = vld [vmem:[#allocation9 + $0x30] sm:$0xff] }
 0x9d7   :  { %v703_v2 = vmul.f32 %v1043_v1, %v701_v0  ;;  %vm708_vm8 = vweird.f32 %v1043_v1  ;;  %847 = vmatpush.msra.mxu0 %v832_v59  ;;  %v827_v0 = vld [vmem:[#allocation9 + $0x10] sm:$0xff] }
 0x9d8   :  { %720 = vrot.lane.b32.xlu1 %v718_v61, %s1168_s0  ;;  %vm709_vm10 = vmor %vm707_vm9, %vm708_vm8  ;;  %v830_v61 = vld [vmem:[#allocation9 + $0x28] sm:$0xff] }
 0x9d9   :  { %v704_v3 = vsub.f32 1.0, %v703_v2  ;;  %848 = vmatpush.msra.mxu0 %v831_v60  ;;  %v825_v2 = vld [vmem:[#allocation9] sm:$0xff] }
 0x9db   :  { %v705_v5 = vmul.f32 %v1043_v1, %v704_v3  ;;  %849 = vmatpush.msra.mxu0 %v830_v61 }
 0x9dd   :  { %v706_v11 = vadd.f32 %v1043_v1, %v705_v5  ;;  %850 = vmatpush.msra.mxu0 %v829_v62 }
 0x9df   :  { %v710_v15 = vsel %vm709_vm10, %v1043_v1, %v706_v11  ;;  %851 = vmatpush.msra.mxu0 %v828_v63  ;;  %v826_v1 = vld [vmem:[#allocation9 + $0x8] sm:$0xff] }
 0x9e0   :  { %v715_v19 = vsel %vm712_vm11, %v714_v16, %v710_v15 }
 0x9e1   :  { %852 = vmatpush.msra.mxu0 %v827_v0 }
 0x9e3   :  { %853 = vmatpush.msra.mxu0 %v826_v1 }
 0x9e5   :  { %854 = vmatpush.msra.mxu0 %v825_v2 }
 0xa4a   :  { %v721_v7 = vpop.permute.xlu1 %720 }
 0xa4b   :  { %v723_v10 = vadd.f32 %v721_v7, %v717_v6  ;;  %v961_v6 = vld [vmem:[%s1344_s3] ss:$0 sm:$0xff] }
 0xa4d   :  { %1044 = vtanh.f32 %v723_v10 }
 0xa53   :  { %v1045_v17 = vpop.eup %1044 }
 0xa54   :  { %v725_v20 = vmul.f32 %v1045_v17, %v715_v19 }
 0xa56   :  { %v729_v22 = vpack.c.bf16 %v725_v20, %v725_v20 }
 0xa58   :  { %731 = vrot.lane.b32.xlu2 %v729_v22, %s1168_s0 }
 0xab2   :  { %v732_v23 = vpop.permute.xlu2 %731 }
 0xab3   :  { %938 = vmatmul.msk.bf16.vlgmr.msrb.gmra.mxu2 %vm70_vm0, %v732_v23  ;;  %939 = vmatmul.msk.bf16.vlgmr.msrb.gmra.mxu3 %vm70_vm0, %v732_v23 }
 0xb36   :  { %v745_v27 = vpop.f32.mrf.mxu2  ;;  %v758_v28 = vpop.f32.mrf.mxu3 }
 0xb37   :  { %v762_v29 = vadd.f32 %v745_v27, %v727_v25  ;;  %v763_v37 = vadd.f32 %v758_v28, %v728_v35 }
 0xb39   :  { %v940_v30 = vmul.f32 -1.442695, %v762_v29  ;;  %v941_v49 = vmul.f32 -1.442695, %v763_v37 }
 0xb3b   :  { %1046 = vpow2.f32 %v940_v30 }
 0xb3e   :  { %v747_v31 = vpop.f32.mrf.mxu2  ;;  %v760_v32 = vpop.f32.mrf.mxu3 }
 0xb41   :  { %v1047_v33 = vpop.eup %1046 }
 0xb42   :  { %v767_v34 = vadd.f32 1.0, %v1047_v33 }
 0xb44   :  { %1048 = vrcp.f32 %v767_v34  ;;  %v779_v40 = vand.u32 2147483648, %v767_v34  ;;  %v777_v42 = vand.u32 2147483647, %v767_v34  ;;  %vm773_vm13 = vweird.f32 %v767_v34 }
 0xb45   :  { %1050 = vtanh.f32 %v763_v37 }
 0xb46   :  { %v780_v44 = vor.u32 1.1754944e-38, %v779_v40  ;;  %vm778_vm15 = vcmp.eq.f32.partialorder %v777_v42, 8.507059e+37  ;;  %1052 = vpow2.f32 %v941_v49 }
 0xb4a   :  { %v1049_v36 = vpop.eup %1048 }
 0xb4b   :  { %v769_v38 = vmul.f32 %v1049_v36, %v767_v34  ;;  %vm774_vm12 = vweird.f32 %v1049_v36  ;;  %v1051_v46 = vpop.eup %1050 }
 0xb4c   :  { %vm775_vm14 = vmor %vm773_vm13, %vm774_vm12  ;;  %v1053_v50 = vpop.eup %1052 }
 0xb4d   :  { %v770_v39 = vsub.f32 1.0, %v769_v38  ;;  %v787_v4 = vadd.f32 1.0, %v1053_v50 }
 0xb4f   :  { %v771_v41 = vmul.f32 %v1049_v36, %v770_v39  ;;  %1054 = vrcp.f32 %v787_v4  ;;  %v799_v24 = vand.u32 2147483648, %v787_v4  ;;  %vm793_vm2 = vweird.f32 %v787_v4 }
 0xb50   :  { %v797_v54 = vand.u32 2147483647, %v787_v4 }
 0xb51   :  { %v772_v43 = vadd.f32 %v1049_v36, %v771_v41  ;;  %v800_v55 = vor.u32 1.1754944e-38, %v799_v24 }
 0xb52   :  { %vm798_vm4 = vcmp.eq.f32.partialorder %v797_v54, 8.507059e+37 }
 0xb53   :  { %v776_v45 = vsel %vm775_vm14, %v1049_v36, %v772_v43 }
 0xb54   :  { %v781_v47 = vsel %vm778_vm15, %v780_v44, %v776_v45 }
 0xb55   :  { %v804_v48 = vmul.f32 %v1051_v46, %v781_v47  ;;  %v1055_v9 = vpop.eup %1054  ;;  %v803_v52 = vmul.f32 %v781_v47, %v723_v10 }
 0xb56   :  { %v789_v51 = vmul.f32 %v1055_v9, %v787_v4  ;;  %vm794_vm1 = vweird.f32 %v1055_v9 }
 0xb57   :  { %806 = vrot.lane.b32.xlu0 %v804_v48, %s1168_s0  ;;  %vm795_vm3 = vmor %vm793_vm2, %vm794_vm1 }
 0xb58   :  { %v790_v8 = vsub.f32 1.0, %v789_v51 }
 0xb5a   :  { %v791_v14 = vmul.f32 %v1055_v9, %v790_v8 }
 0xb5c   :  { %v792_v21 = vadd.f32 %v1055_v9, %v791_v14 }
 0xb5e   :  { %v796_v26 = vsel %vm795_vm3, %v1055_v9, %v792_v21 }
 0xb5f   :  { %v801_v57 = vsel %vm798_vm4, %v800_v55, %v796_v26 }
 0xbc9   :  { %v807_v18 = vpop.permute.xlu0 %806 }
 0xbca   :  { %v809_v53 = vadd.f32 %v807_v18, %v803_v52 }
 0xbcc   :  { %1056 = vtanh.f32 %v809_v53  ;;  %818 = vrot.lane.b32.xlu2 %v809_v53, %s1168_s0 }
 0xbd2   :  { %v1057_v56 = vpop.eup %1056 }
 0xbd3   :  { %v811_v58 = vmul.f32 %v1057_v56, %v801_v57 }
 0xbd5   :  { %813 = vrot.lane.b32.xlu1 %v811_v58, %s1168_s0 }
 0xc26   :  { %v819_v3 = vpop.permute.xlu2 %818 }
 0xc27   :  { %821 = vst.msk [vmem:[#allocation3] sm:$0xff] %vm70_vm0, %v819_v3 }
 0xc47   :  { %v814_v5 = vpop.permute.xlu1 %813 }
 0xc48   :  { %816 = vst.msk [vmem:[#allocation2] sm:$0xff] %vm70_vm0, %v814_v5  ;;  %942 = vmatmul.msk.f32.vlgmr.msra.gmra.mxu0 %vm70_vm0, %v814_v5 }
 0xcc5   :  { %v856_v7 = vpop.f32.mrf.mxu0 }
 0xcc6   :  { %v857_v10 = vadd.f32 %v961_v6, %v856_v7 }
 0xcc8   :  { %859 = vst [vmem:[#allocation10] sm:$0xff] %v857_v10 }
 0xcc9   :  { %870 = dma.vmem_to_hbm [thread:$0]  %s866_s9, 128, %s868_s12, [#allocation6]  }
 0xcca   :  { %1158 = dma.done.wait [#allocation6], 128  }
 0xccb   :  { %1159 = vsyncadd [#allocation6], 4294967168 }
 0xccc   :  { %875 = vsyncpa [#allocation5], 1 }
 0xccd   :  { %876 = vsyncpa [#allocation8], 1 }
 0xcce   :  { %877 = vsyncpa [#allocation6], 1 }

</bundles_post_ra>
